<compile_context>
chip_gen: v7x
topology: tpu7x:2x2x1
jax: 0.10.0
libtpu: 0.0.40
codegen_flags: <defaults>
</compile_context>

<pallas_src>
import functools

import jax
import jax.numpy as jnp
from jax.experimental import pallas as pl
from jax.experimental.pallas import tpu as pltpu


def _silu(x):
    return x * jax.nn.sigmoid(x)


# ----------------------------- fused Pallas kernel ---------------------------

def _gnn_layer_kernel(
    h0_ref, ea_ref, row_e_ref, row_n_ref, col_e_ref,
    emb_w_ref, emb_b_ref,
    we1st_ref, we1a_ref, be1_ref, we2_ref, be2_ref,
    wn1h_ref, wn1a_ref, bn1_ref, wn2_ref, bn2_ref,
    out_w_ref, out_b_ref,
    o_ref,
    h_ref, row_oh_ref, row_oht_ref, col_oh_ref,
    *, hidden_nf, inv_norm,
):
    f32 = jnp.float32
    H = hidden_nf
    layer = pl.program_id(0)

    @pl.when(layer == 0)
    def _init():
        # node embedding (fused first linear)
        h_ref[...] = (
            jnp.dot(h0_ref[...], emb_w_ref[...], preferred_element_type=f32)
            + emb_b_ref[...]
        )
        # Build gather/scatter one-hots once, in VMEM, from int32 edge indices.
        # Both orientations are built directly with iota compares so the
        # scatter matmul contracts over the LHS minor dim (no XLU transpose).
        e, n = row_oh_ref.shape
        lane_node = jax.lax.broadcasted_iota(jnp.int32, (e, n), 1)    # [E, N]
        row_oh_ref[...] = (lane_node == row_e_ref[...]).astype(f32)   # [E, N]
        col_oh_ref[...] = (lane_node == col_e_ref[...]).astype(f32)   # [E, N]
        sub_node = jax.lax.broadcasted_iota(jnp.int32, (n, e), 0)     # [N, E]
        row_oht_ref[...] = (sub_node == row_n_ref[...]).astype(f32)   # [N, E]

    h = h_ref[...]                                                    # [N, H]

    # ---- edge model ----------------------------------------------------------
    # Fused per-node src/dst projection (one [N,H]x[H,2H] matmul), hoisted
    # ahead of the E-row one-hot gathers.
    pst = jnp.dot(h, we1st_ref[...], preferred_element_type=f32)      # [N, 2H]
    ps = pst[:, :H]
    pt = pst[:, H:]
    # TODO(synk): fold the tiny-K (Fe=2) edge_attr projection into the col
    # gather contraction ([col_oh | ea] @ [pt ; we1a]) once unaligned-concat
    # lowering is verified on all target generations.
    e1 = (
        jnp.dot(row_oh_ref[...], ps, preferred_element_type=f32)      # src branch
        + jnp.dot(col_oh_ref[...], pt, preferred_element_type=f32)    # dst branch
        + jnp.dot(ea_ref[...], we1a_ref[...], preferred_element_type=f32)
        + be1_ref[...]
    )
    e1 = _silu(e1)
    mij = _silu(jnp.dot(e1, we2_ref[...], preferred_element_type=f32)
                + be2_ref[...])                                       # [E, H]

    # ---- aggregation: unsorted_segment_sum over `row` ------------------------
    agg = jnp.dot(row_oht_ref[...], mij, preferred_element_type=f32)  # [N, H]
    if inv_norm != 1.0:  # aggregation='sum' -> divide by normalization_factor
        agg = agg * inv_norm

    # ---- node model + residual -----------------------------------------------
    n1 = _silu(
        jnp.dot(h, wn1h_ref[...], preferred_element_type=f32)
        + jnp.dot(agg, wn1a_ref[...], preferred_element_type=f32)
        + bn1_ref[...]
    )
    h_new = h + jnp.dot(n1, wn2_ref[...], preferred_element_type=f32) + bn2_ref[...]
    h_ref[...] = h_new

    @pl.when(layer == pl.num_programs(0) - 1)
    def _final():
        # output embedding (fused last linear).  TODO(synk): for real configs
        # write through a lane-dense (>=128-wide) slab instead of out_nf=4.
        o_ref[...] = (
            jnp.dot(h_new, out_w_ref[...], preferred_element_type=f32)
            + out_b_ref[...]
        )


# ------------------------------ GNN wrapper ----------------------------------

@functools.partial(jax.jit, static_argnames=("n_layers", "normalization_factor"))
def gnn_forward(h, edge_attr, row, col, params, n_layers, normalization_factor=1.0):
    n, in_nf = h.shape
    e, fe = edge_attr.shape
    hid = params["emb_w"].shape[1]
    out_nf = params["out_w"].shape[1]

    # Tiny int32 index arrays (both orientations, so both one-hot layouts can
    # be built in-kernel without any transpose).
    row_e = row.astype(jnp.int32)[:, None]      # [E, 1]
    row_n = row.astype(jnp.int32)[None, :]      # [1, E]
    col_e = col.astype(jnp.int32)[:, None]      # [E, 1]

    inputs = (
        h, edge_attr, row_e, row_n, col_e,
        params["emb_w"], params["emb_b"],
        params["we1st"], params["we1a"], params["be1"],
        params["we2"], params["be2"],
        params["wn1h"], params["wn1a"], params["bn1"],
        params["wn2"], params["bn2"],
        params["out_w"], params["out_b"],
    )

    # Resident inputs: full block, constant index map (DMA'd once, no re-fetch).
    def full(x):
        nd = x.ndim
        return pl.BlockSpec(x.shape, lambda l, _nd=nd: (0,) * _nd)

    # Per-layer weights: leading layer dim squeezed, blocked on the grid index
    # -> the pipeline prefetches layer l+1 weights behind layer l compute.
    def per_layer(x):
        nd = x.ndim
        return pl.BlockSpec((None,) + x.shape[1:],
                            lambda l, _nd=nd: (l,) + (0,) * (_nd - 1))

    in_specs = [
        full(h), full(edge_attr), full(row_e), full(row_n), full(col_e),
        full(params["emb_w"]), full(params["emb_b"]),
        per_layer(params["we1st"]), per_layer(params["we1a"]), per_layer(params["be1"]),
        per_layer(params["we2"]), per_layer(params["be2"]),
        per_layer(params["wn1h"]), per_layer(params["wn1a"]), per_layer(params["bn1"]),
        per_layer(params["wn2"]), per_layer(params["bn2"]),
        full(params["out_w"]), full(params["out_b"]),
    ]

    grid_spec = pltpu.PrefetchScalarGridSpec(
        num_scalar_prefetch=0,
        grid=(n_layers,),                      # sequential layer axis
        in_specs=in_specs,
        out_specs=pl.BlockSpec((n, out_nf), lambda l: (0, 0)),
        scratch_shapes=[
            pltpu.VMEM((n, hid), jnp.float32),   # resident node features h
            pltpu.VMEM((e, n), jnp.float32),     # row one-hot  [E, N] (gather)
            pltpu.VMEM((n, e), jnp.float32),     # row one-hot^T [N, E] (scatter)
            pltpu.VMEM((e, n), jnp.float32),     # col one-hot  [E, N] (gather)
        ],
    )

    # Advisory cost estimate for the XLA scheduler.
    flops = (
        2 * n * in_nf * hid + 2 * n * hid * out_nf
        + n_layers * (
            2 * n * hid * (2 * hid)      # fused src/dst projection
            + 2 * 2 * e * n * hid        # one-hot gathers
            + 2 * e * fe * hid           # edge_attr projection
            + 2 * e * hid * hid          # edge MLP layer 2
            + 2 * n * e * hid            # scatter-sum matmul
            + 2 * 3 * n * hid * hid      # node MLP
        )
    )
    transcendentals = n_layers * (2 * e * hid + n * hid)      # SiLU sigmoids
    bytes_accessed = (sum(int(x.size) * x.dtype.itemsize for x in inputs)
                      + n * out_nf * 4)

    kernel = functools.partial(
        _gnn_layer_kernel,
        hidden_nf=hid,
        inv_norm=1.0 / float(normalization_factor),
    )
    # Everything here fits the default 32 MiB scoped VMEM on all generations;
    # for real graph sizes raise vmem_limit_bytes per-generation (64 MiB phys
    # on v7x vs 128 MiB on v5e/v6e) and tile the edge axis.
    return pl.pallas_call(
        kernel,
        out_shape=jax.ShapeDtypeStruct((n, out_nf), jnp.float32),
        grid_spec=grid_spec,
        compiler_params=pltpu.CompilerParams(
            dimension_semantics=("arbitrary",)),
        cost_estimate=pl.CostEstimate(
            flops=flops,
            transcendentals=transcendentals,
            bytes_accessed=bytes_accessed,
        ),
    )(*inputs)


# --------------------------- pure-JAX reference ------------------------------

def gnn_reference(h, edge_attr, row, col, params, n_layers, normalization_factor=1.0):
    n = h.shape[0]
    hid = params["emb_w"].shape[1]
    h = h @ params["emb_w"] + params["emb_b"]
    for i in range(n_layers):
        we1 = jnp.concatenate(
            [params["we1st"][i, :, :hid],          # src rows
             params["we1st"][i, :, hid:],          # dst rows
             params["we1a"][i]], axis=0)           # edge_attr rows
        wn1 = jnp.concatenate([params["wn1h"][i], params["wn1a"][i]], axis=0)
        src, dst = h[row], h[col]
        e_in = jnp.concatenate([src, dst, edge_attr], axis=1)
        mij = _silu(
            _silu(e_in @ we1 + params["be1"][i]) @ params["we2"][i]
            + params["be2"][i]
        )
        agg = jnp.zeros((n, h.shape[1]), jnp.float32).at[row].add(mij)
        agg = agg / normalization_factor
        n_in = jnp.concatenate([h, agg], axis=1)
        h = h + _silu(n_in @ wn1 + params["bn1"][i]) @ params["wn2"][i] \
            + params["bn2"][i]
    h = h @ params["out_w"] + params["out_b"]
    return h


# ------------------------------ param setup ----------------------------------

def _init_linear(key, fan_in, fan_out):
    kw, kb = jax.random.split(key)
    bound = 1.0 / jnp.sqrt(fan_in)
    w = jax.random.uniform(kw, (fan_in, fan_out), jnp.float32, -bound, bound)
    b = jax.random.uniform(kb, (1, fan_out), jnp.float32, -bound, bound)
    return w, b


def init_params(key, in_node_nf, in_edge_nf, hidden_nf, out_node_nf, n_layers):
    keys = jax.random.split(key, 2 + 4 * n_layers)
    emb_w, emb_b = _init_linear(keys[0], in_node_nf, hidden_nf)
    out_w, out_b = _init_linear(keys[1], hidden_nf, out_node_nf)

    we1st, we1a, be1 = [], [], []
    we2, be2 = [], []
    wn1h, wn1a, bn1 = [], [], []
    wn2, bn2 = [], []
    for i in range(n_layers):
        k0, k1, k2, k3 = keys[2 + 4 * i: 2 + 4 * (i + 1)]
        # PyTorch nn.Linear init with the *full* concatenated fan-in, then
        # pre-split / pre-fused once here (no per-call slicing, no in-kernel
        # concat; src/dst blocks fused along the output axis -> one matmul).
        w, b = _init_linear(k0, 2 * hidden_nf + in_edge_nf, hidden_nf)
        we1st.append(jnp.concatenate(
            [w[:hidden_nf], w[hidden_nf:2 * hidden_nf]], axis=1))   # [H, 2H]
        we1a.append(w[2 * hidden_nf:])
        be1.append(b)
        w, b = _init_linear(k1, hidden_nf, hidden_nf)
        we2.append(w); be2.append(b)
        w, b = _init_linear(k2, 2 * hidden_nf, hidden_nf)
        wn1h.append(w[:hidden_nf]); wn1a.append(w[hidden_nf:]); bn1.append(b)
        w, b = _init_linear(k3, hidden_nf, hidden_nf)
        wn2.append(w); bn2.append(b)

    stack = lambda xs: jnp.stack(xs, axis=0)
    return dict(
        emb_w=emb_w, emb_b=emb_b, out_w=out_w, out_b=out_b,
        we1st=stack(we1st), we1a=stack(we1a), be1=stack(be1),
        we2=stack(we2), be2=stack(be2),
        wn1h=stack(wn1h), wn1a=stack(wn1a), bn1=stack(bn1),
        wn2=stack(wn2), bn2=stack(bn2),
    )


# --------------------------------- main --------------------------------------

if __name__ == "__main__":
    in_node_nf = 4
    in_edge_nf = 2
    hidden_nf = 32
    out_node_nf = in_node_nf      # module default: out_node_nf = in_node_nf
    n_layers = 4
    N = 8                         # nodes

    key = jax.random.PRNGKey(0)
    k_params, k_h, k_ea = jax.random.split(key, 3)

    params = init_params(k_params, in_node_nf, in_edge_nf, hidden_nf,
                         out_node_nf, n_layers)

    # fully connected graph without self-loops: E = N * (N - 1) = 56 edges
    rows, cols = [], []
    for i in range(N):
        for j in range(N):
            if i != j:
                rows.append(i)
                cols.append(j)
    row = jnp.asarray(rows, dtype=jnp.int32)
    col = jnp.asarray(cols, dtype=jnp.int32)
    E = row.shape[0]

    h = jax.random.normal(k_h, (N, in_node_nf), jnp.float32)
    edge_attr = jax.random.normal(k_ea, (E, in_edge_nf), jnp.float32)

    out = gnn_forward(h, edge_attr, row, col, params, n_layers=n_layers)
    out = jax.block_until_ready(out)

    ref = gnn_reference(h, edge_attr, row, col, params, n_layers)
    assert out.shape == (N, out_node_nf), out.shape
    assert jnp.allclose(out, ref, atol=1e-4, rtol=1e-4), (
        float(jnp.max(jnp.abs(out - ref)))
    )

    print("KERNEL_OK")
</pallas_src>

<mosaic_0001>
module attributes {stable_mosaic.version = 11 : i64} {
  func.func @_gnn_layer_kernel(%arg0: i32, %arg1: memref<8x4xf32, #tpu.memory_space<vmem>>, %arg2: memref<56x2xf32, #tpu.memory_space<vmem>>, %arg3: memref<56x1xi32, #tpu.memory_space<vmem>>, %arg4: memref<1x56xi32, #tpu.memory_space<vmem>>, %arg5: memref<56x1xi32, #tpu.memory_space<vmem>>, %arg6: memref<4x32xf32, #tpu.memory_space<vmem>>, %arg7: memref<1x32xf32, #tpu.memory_space<vmem>>, %arg8: memref<1x32x64xf32, #tpu.memory_space<vmem>>, %arg9: memref<1x2x32xf32, #tpu.memory_space<vmem>>, %arg10: memref<1x1x32xf32, #tpu.memory_space<vmem>>, %arg11: memref<1x32x32xf32, #tpu.memory_space<vmem>>, %arg12: memref<1x1x32xf32, #tpu.memory_space<vmem>>, %arg13: memref<1x32x32xf32, #tpu.memory_space<vmem>>, %arg14: memref<1x32x32xf32, #tpu.memory_space<vmem>>, %arg15: memref<1x1x32xf32, #tpu.memory_space<vmem>>, %arg16: memref<1x32x32xf32, #tpu.memory_space<vmem>>, %arg17: memref<1x1x32xf32, #tpu.memory_space<vmem>>, %arg18: memref<32x4xf32, #tpu.memory_space<vmem>>, %arg19: memref<1x4xf32, #tpu.memory_space<vmem>>, %arg20: memref<8x4xf32, #tpu.memory_space<vmem>>, %arg21: memref<8x32xf32, #tpu.memory_space<vmem>>, %arg22: memref<56x8xf32, #tpu.memory_space<vmem>>, %arg23: memref<8x56xf32, #tpu.memory_space<vmem>>, %arg24: memref<56x8xf32, #tpu.memory_space<vmem>>) attributes {dimension_semantics = [#tpu.dimension_semantics<arbitrary>], iteration_bounds = array<i64: 4>, scalar_prefetch = 0 : i64, scratch_operands = 4 : i64, tpu.core_type = #tpu.core_type<tc>, window_params = [{pipeline_mode = #tpu.pipeline_mode<synchronous>, transform_indices = @transform_0, window_bounds = array<i64: 8, 4>}, {pipeline_mode = #tpu.pipeline_mode<synchronous>, transform_indices = @transform_1, window_bounds = array<i64: 56, 2>}, {pipeline_mode = #tpu.pipeline_mode<synchronous>, transform_indices = @transform_2, window_bounds = array<i64: 56, 1>}, {pipeline_mode = #tpu.pipeline_mode<synchronous>, transform_indices = @transform_3, window_bounds = array<i64: 1, 56>}, {pipeline_mode = #tpu.pipeline_mode<synchronous>, transform_indices = @transform_4, window_bounds = array<i64: 56, 1>}, {pipeline_mode = #tpu.pipeline_mode<synchronous>, transform_indices = @transform_5, window_bounds = array<i64: 4, 32>}, {pipeline_mode = #tpu.pipeline_mode<synchronous>, transform_indices = @transform_6, window_bounds = array<i64: 1, 32>}, {transform_indices = @transform_7, window_bounds = array<i64: 1, 32, 64>}, {transform_indices = @transform_8, window_bounds = array<i64: 1, 2, 32>}, {transform_indices = @transform_9, window_bounds = array<i64: 1, 1, 32>}, {transform_indices = @transform_10, window_bounds = array<i64: 1, 32, 32>}, {transform_indices = @transform_11, window_bounds = array<i64: 1, 1, 32>}, {transform_indices = @transform_12, window_bounds = array<i64: 1, 32, 32>}, {transform_indices = @transform_13, window_bounds = array<i64: 1, 32, 32>}, {transform_indices = @transform_14, window_bounds = array<i64: 1, 1, 32>}, {transform_indices = @transform_15, window_bounds = array<i64: 1, 32, 32>}, {transform_indices = @transform_16, window_bounds = array<i64: 1, 1, 32>}, {pipeline_mode = #tpu.pipeline_mode<synchronous>, transform_indices = @transform_17, window_bounds = array<i64: 32, 4>}, {pipeline_mode = #tpu.pipeline_mode<synchronous>, transform_indices = @transform_18, window_bounds = array<i64: 1, 4>}, {pipeline_mode = #tpu.pipeline_mode<synchronous>, transform_indices = @transform_19, window_bounds = array<i64: 8, 4>}]} {
    %c0_i32 = arith.constant 0 : i32
    %0 = arith.cmpi eq, %arg0, %c0_i32 : i32
    %1 = arith.extui %0 : i1 to i32
    %c0_i32_0 = arith.constant 0 : i32
    %2 = arith.cmpi ne, %1, %c0_i32_0 : i32
    scf.if %2 {
      %c0_54 = arith.constant 0 : index
      %c0_55 = arith.constant 0 : index
      %73 = vector.load %arg1[%c0_54, %c0_55] : memref<8x4xf32, #tpu.memory_space<vmem>>, vector<8x4xf32>
      %c0_56 = arith.constant 0 : index
      %c0_57 = arith.constant 0 : index
      %74 = vector.load %arg6[%c0_56, %c0_57] : memref<4x32xf32, #tpu.memory_space<vmem>>, vector<4x32xf32>
      %cst_58 = arith.constant dense<0.000000e+00> : vector<8x32xf32>
      %75 = tpu.matmul %73, %74, %cst_58 {dimension_numbers = #tpu.dot_dimension_numbers<[1], [0], [0], [1], [0, 0, 1, 1], [], []>} : vector<8x4xf32>, vector<4x32xf32>, vector<8x32xf32> -> vector<8x32xf32>
      %c0_59 = arith.constant 0 : index
      %c0_60 = arith.constant 0 : index
      %76 = vector.load %arg7[%c0_59, %c0_60] : memref<1x32xf32, #tpu.memory_space<vmem>>, vector<1x32xf32>
      %77 = vector.broadcast %76 : vector<1x32xf32> to vector<8x32xf32>
      %78 = arith.addf %75, %77 : vector<8x32xf32>
      %c0_61 = arith.constant 0 : index
      %c0_62 = arith.constant 0 : index
      %79 = vector.load %arg21[%c0_61, %c0_62] : memref<8x32xf32, #tpu.memory_space<vmem>>, vector<8x32xf32>
      tpu.vector_store %arg21[%c0_61, %c0_62], %78 {strides = array<i32>} : memref<8x32xf32, #tpu.memory_space<vmem>>, vector<8x32xf32>,
      %80 = tpu.iota {dimensions = array<i32: 1>} : vector<56x8xi32>
      %c0_63 = arith.constant 0 : index
      %c0_64 = arith.constant 0 : index
      %81 = vector.load %arg3[%c0_63, %c0_64] : memref<56x1xi32, #tpu.memory_space<vmem>>, vector<56x1xi32>
      %82 = vector.broadcast %81 : vector<56x1xi32> to vector<56x8xi32>
      %83 = arith.cmpi eq, %80, %82 : vector<56x8xi32>
      %84 = arith.extui %83 : vector<56x8xi1> to vector<56x8xi32>
      %85 = arith.sitofp %84 : vector<56x8xi32> to vector<56x8xf32>
      %c0_65 = arith.constant 0 : index
      %c0_66 = arith.constant 0 : index
      %86 = vector.load %arg22[%c0_65, %c0_66] : memref<56x8xf32, #tpu.memory_space<vmem>>, vector<56x8xf32>
      tpu.vector_store %arg22[%c0_65, %c0_66], %85 {strides = array<i32>} : memref<56x8xf32, #tpu.memory_space<vmem>>, vector<56x8xf32>,
      %c0_67 = arith.constant 0 : index
      %c0_68 = arith.constant 0 : index
      %87 = vector.load %arg5[%c0_67, %c0_68] : memref<56x1xi32, #tpu.memory_space<vmem>>, vector<56x1xi32>
      %88 = vector.broadcast %87 : vector<56x1xi32> to vector<56x8xi32>
      %89 = arith.cmpi eq, %80, %88 : vector<56x8xi32>
      %90 = arith.extui %89 : vector<56x8xi1> to vector<56x8xi32>
      %91 = arith.sitofp %90 : vector<56x8xi32> to vector<56x8xf32>
      %c0_69 = arith.constant 0 : index
      %c0_70 = arith.constant 0 : index
      %92 = vector.load %arg24[%c0_69, %c0_70] : memref<56x8xf32, #tpu.memory_space<vmem>>, vector<56x8xf32>
      tpu.vector_store %arg24[%c0_69, %c0_70], %91 {strides = array<i32>} : memref<56x8xf32, #tpu.memory_space<vmem>>, vector<56x8xf32>,
      %93 = tpu.iota {dimensions = array<i32: 0>} : vector<8x56xi32>
      %c0_71 = arith.constant 0 : index
      %c0_72 = arith.constant 0 : index
      %94 = vector.load %arg4[%c0_71, %c0_72] : memref<1x56xi32, #tpu.memory_space<vmem>>, vector<1x56xi32>
      %95 = vector.broadcast %94 : vector<1x56xi32> to vector<8x56xi32>
      %96 = arith.cmpi eq, %93, %95 : vector<8x56xi32>
      %97 = arith.extui %96 : vector<8x56xi1> to vector<8x56xi32>
      %98 = arith.sitofp %97 : vector<8x56xi32> to vector<8x56xf32>
      %c0_73 = arith.constant 0 : index
      %c0_74 = arith.constant 0 : index
      %99 = vector.load %arg23[%c0_73, %c0_74] : memref<8x56xf32, #tpu.memory_space<vmem>>, vector<8x56xf32>
      tpu.vector_store %arg23[%c0_73, %c0_74], %98 {strides = array<i32>} : memref<8x56xf32, #tpu.memory_space<vmem>>, vector<8x56xf32>,
    } else {
    }
    %c0 = arith.constant 0 : index
    %c0_1 = arith.constant 0 : index
    %3 = vector.load %arg21[%c0, %c0_1] : memref<8x32xf32, #tpu.memory_space<vmem>>, vector<8x32xf32>
    %c0_2 = arith.constant 0 : index
    %c0_3 = arith.constant 0 : index
    %c0_4 = arith.constant 0 : index
    %4 = vector.load %arg8[%c0_2, %c0_3, %c0_4] : memref<1x32x64xf32, #tpu.memory_space<vmem>>, vector<1x32x64xf32>
    %5 = vector.shape_cast %4 : vector<1x32x64xf32> to vector<32x64xf32>
    %cst = arith.constant dense<0.000000e+00> : vector<8x64xf32>
    %6 = tpu.matmul %3, %5, %cst {dimension_numbers = #tpu.dot_dimension_numbers<[1], [0], [0], [1], [0, 0, 1, 1], [], []>} : vector<8x32xf32>, vector<32x64xf32>, vector<8x64xf32> -> vector<8x64xf32>
    %7 = vector.extract_strided_slice %6 {offsets = [0, 0], sizes = [8, 32], strides = [1, 1]} : vector<8x64xf32> to vector<8x32xf32>
    %8 = vector.extract_strided_slice %6 {offsets = [0, 32], sizes = [8, 32], strides = [1, 1]} : vector<8x64xf32> to vector<8x32xf32>
    %c0_5 = arith.constant 0 : index
    %c0_6 = arith.constant 0 : index
    %9 = vector.load %arg22[%c0_5, %c0_6] : memref<56x8xf32, #tpu.memory_space<vmem>>, vector<56x8xf32>
    %cst_7 = arith.constant dense<0.000000e+00> : vector<56x32xf32>
    %10 = tpu.matmul %9, %7, %cst_7 {dimension_numbers = #tpu.dot_dimension_numbers<[1], [0], [0], [1], [0, 0, 1, 1], [], []>} : vector<56x8xf32>, vector<8x32xf32>, vector<56x32xf32> -> vector<56x32xf32>
    %c0_8 = arith.constant 0 : index
    %c0_9 = arith.constant 0 : index
    %11 = vector.load %arg24[%c0_8, %c0_9] : memref<56x8xf32, #tpu.memory_space<vmem>>, vector<56x8xf32>
    %cst_10 = arith.constant dense<0.000000e+00> : vector<56x32xf32>
    %12 = tpu.matmul %11, %8, %cst_10 {dimension_numbers = #tpu.dot_dimension_numbers<[1], [0], [0], [1], [0, 0, 1, 1], [], []>} : vector<56x8xf32>, vector<8x32xf32>, vector<56x32xf32> -> vector<56x32xf32>
    %13 = arith.addf %10, %12 : vector<56x32xf32>
    %c0_11 = arith.constant 0 : index
    %c0_12 = arith.constant 0 : index
    %14 = vector.load %arg2[%c0_11, %c0_12] : memref<56x2xf32, #tpu.memory_space<vmem>>, vector<56x2xf32>
    %c0_13 = arith.constant 0 : index
    %c0_14 = arith.constant 0 : index
    %c0_15 = arith.constant 0 : index
    %15 = vector.load %arg9[%c0_13, %c0_14, %c0_15] : memref<1x2x32xf32, #tpu.memory_space<vmem>>, vector<1x2x32xf32>
    %16 = vector.shape_cast %15 : vector<1x2x32xf32> to vector<2x32xf32>
    %cst_16 = arith.constant dense<0.000000e+00> : vector<56x32xf32>
    %17 = tpu.matmul %14, %16, %cst_16 {dimension_numbers = #tpu.dot_dimension_numbers<[1], [0], [0], [1], [0, 0, 1, 1], [], []>} : vector<56x2xf32>, vector<2x32xf32>, vector<56x32xf32> -> vector<56x32xf32>
    %18 = arith.addf %13, %17 : vector<56x32xf32>
    %c0_17 = arith.constant 0 : index
    %c0_18 = arith.constant 0 : index
    %c0_19 = arith.constant 0 : index
    %19 = vector.load %arg10[%c0_17, %c0_18, %c0_19] : memref<1x1x32xf32, #tpu.memory_space<vmem>>, vector<1x1x32xf32>
    %20 = vector.shape_cast %19 : vector<1x1x32xf32> to vector<1x32xf32>
    %21 = vector.broadcast %20 : vector<1x32xf32> to vector<56x32xf32>
    %22 = arith.addf %18, %21 : vector<56x32xf32>
    %23 = arith.negf %22 : vector<56x32xf32>
    %24 = math.exp %23 : vector<56x32xf32>
    %cst_20 = arith.constant 1.000000e+00 : f32
    %25 = vector.broadcast %cst_20 : f32 to vector<56x32xf32>
    %26 = arith.addf %25, %24 : vector<56x32xf32>
    %27 = arith.divf %25, %26 : vector<56x32xf32>
    %28 = arith.mulf %22, %27 : vector<56x32xf32>
    %c0_21 = arith.constant 0 : index
    %c0_22 = arith.constant 0 : index
    %c0_23 = arith.constant 0 : index
    %29 = vector.load %arg11[%c0_21, %c0_22, %c0_23] : memref<1x32x32xf32, #tpu.memory_space<vmem>>, vector<1x32x32xf32>
    %30 = vector.shape_cast %29 : vector<1x32x32xf32> to vector<32x32xf32>
    %cst_24 = arith.constant dense<0.000000e+00> : vector<56x32xf32>
    %31 = tpu.matmul %28, %30, %cst_24 {dimension_numbers = #tpu.dot_dimension_numbers<[1], [0], [0], [1], [0, 0, 1, 1], [], []>} : vector<56x32xf32>, vector<32x32xf32>, vector<56x32xf32> -> vector<56x32xf32>
    %c0_25 = arith.constant 0 : index
    %c0_26 = arith.constant 0 : index
    %c0_27 = arith.constant 0 : index
    %32 = vector.load %arg12[%c0_25, %c0_26, %c0_27] : memref<1x1x32xf32, #tpu.memory_space<vmem>>, vector<1x1x32xf32>
    %33 = vector.shape_cast %32 : vector<1x1x32xf32> to vector<1x32xf32>
    %34 = vector.broadcast %33 : vector<1x32xf32> to vector<56x32xf32>
    %35 = arith.addf %31, %34 : vector<56x32xf32>
    %36 = arith.negf %35 : vector<56x32xf32>
    %37 = math.exp %36 : vector<56x32xf32>
    %cst_28 = arith.constant 1.000000e+00 : f32
    %38 = vector.broadcast %cst_28 : f32 to vector<56x32xf32>
    %39 = arith.addf %38, %37 : vector<56x32xf32>
    %40 = arith.divf %38, %39 : vector<56x32xf32>
    %41 = arith.mulf %35, %40 : vector<56x32xf32>
    %c0_29 = arith.constant 0 : index
    %c0_30 = arith.constant 0 : index
    %42 = vector.load %arg23[%c0_29, %c0_30] : memref<8x56xf32, #tpu.memory_space<vmem>>, vector<8x56xf32>
    %cst_31 = arith.constant dense<0.000000e+00> : vector<8x32xf32>
    %43 = tpu.matmul %42, %41, %cst_31 {dimension_numbers = #tpu.dot_dimension_numbers<[1], [0], [0], [1], [0, 0, 1, 1], [], []>} : vector<8x56xf32>, vector<56x32xf32>, vector<8x32xf32> -> vector<8x32xf32>
    %c0_32 = arith.constant 0 : index
    %c0_33 = arith.constant 0 : index
    %c0_34 = arith.constant 0 : index
    %44 = vector.load %arg13[%c0_32, %c0_33, %c0_34] : memref<1x32x32xf32, #tpu.memory_space<vmem>>, vector<1x32x32xf32>
    %45 = vector.shape_cast %44 : vector<1x32x32xf32> to vector<32x32xf32>
    %cst_35 = arith.constant dense<0.000000e+00> : vector<8x32xf32>
    %46 = tpu.matmul %3, %45, %cst_35 {dimension_numbers = #tpu.dot_dimension_numbers<[1], [0], [0], [1], [0, 0, 1, 1], [], []>} : vector<8x32xf32>, vector<32x32xf32>, vector<8x32xf32> -> vector<8x32xf32>
    %c0_36 = arith.constant 0 : index
    %c0_37 = arith.constant 0 : index
    %c0_38 = arith.constant 0 : index
    %47 = vector.load %arg14[%c0_36, %c0_37, %c0_38] : memref<1x32x32xf32, #tpu.memory_space<vmem>>, vector<1x32x32xf32>
    %48 = vector.shape_cast %47 : vector<1x32x32xf32> to vector<32x32xf32>
    %cst_39 = arith.constant dense<0.000000e+00> : vector<8x32xf32>
    %49 = tpu.matmul %43, %48, %cst_39 {dimension_numbers = #tpu.dot_dimension_numbers<[1], [0], [0], [1], [0, 0, 1, 1], [], []>} : vector<8x32xf32>, vector<32x32xf32>, vector<8x32xf32> -> vector<8x32xf32>
    %50 = arith.addf %46, %49 : vector<8x32xf32>
    %c0_40 = arith.constant 0 : index
    %c0_41 = arith.constant 0 : index
    %c0_42 = arith.constant 0 : index
    %51 = vector.load %arg15[%c0_40, %c0_41, %c0_42] : memref<1x1x32xf32, #tpu.memory_space<vmem>>, vector<1x1x32xf32>
    %52 = vector.shape_cast %51 : vector<1x1x32xf32> to vector<1x32xf32>
    %53 = vector.broadcast %52 : vector<1x32xf32> to vector<8x32xf32>
    %54 = arith.addf %50, %53 : vector<8x32xf32>
    %55 = arith.negf %54 : vector<8x32xf32>
    %56 = math.exp %55 : vector<8x32xf32>
    %cst_43 = arith.constant 1.000000e+00 : f32
    %57 = vector.broadcast %cst_43 : f32 to vector<8x32xf32>
    %58 = arith.addf %57, %56 : vector<8x32xf32>
    %59 = arith.divf %57, %58 : vector<8x32xf32>
    %60 = arith.mulf %54, %59 : vector<8x32xf32>
    %c0_44 = arith.constant 0 : index
    %c0_45 = arith.constant 0 : index
    %c0_46 = arith.constant 0 : index
    %61 = vector.load %arg16[%c0_44, %c0_45, %c0_46] : memref<1x32x32xf32, #tpu.memory_space<vmem>>, vector<1x32x32xf32>
    %62 = vector.shape_cast %61 : vector<1x32x32xf32> to vector<32x32xf32>
    %cst_47 = arith.constant dense<0.000000e+00> : vector<8x32xf32>
    %63 = tpu.matmul %60, %62, %cst_47 {dimension_numbers = #tpu.dot_dimension_numbers<[1], [0], [0], [1], [0, 0, 1, 1], [], []>} : vector<8x32xf32>, vector<32x32xf32>, vector<8x32xf32> -> vector<8x32xf32>
    %64 = arith.addf %3, %63 : vector<8x32xf32>
    %c0_48 = arith.constant 0 : index
    %c0_49 = arith.constant 0 : index
    %c0_50 = arith.constant 0 : index
    %65 = vector.load %arg17[%c0_48, %c0_49, %c0_50] : memref<1x1x32xf32, #tpu.memory_space<vmem>>, vector<1x1x32xf32>
    %66 = vector.shape_cast %65 : vector<1x1x32xf32> to vector<1x32xf32>
    %67 = vector.broadcast %66 : vector<1x32xf32> to vector<8x32xf32>
    %68 = arith.addf %64, %67 : vector<8x32xf32>
    %c0_51 = arith.constant 0 : index
    %c0_52 = arith.constant 0 : index
    %69 = vector.load %arg21[%c0_51, %c0_52] : memref<8x32xf32, #tpu.memory_space<vmem>>, vector<8x32xf32>
    tpu.vector_store %arg21[%c0_51, %c0_52], %68 {strides = array<i32>} : memref<8x32xf32, #tpu.memory_space<vmem>>, vector<8x32xf32>,
    %c3_i32 = arith.constant 3 : i32
    %70 = arith.cmpi eq, %arg0, %c3_i32 : i32
    %71 = arith.extui %70 : i1 to i32
    %c0_i32_53 = arith.constant 0 : i32
    %72 = arith.cmpi ne, %71, %c0_i32_53 : i32
    scf.if %72 {
      %c0_54 = arith.constant 0 : index
      %c0_55 = arith.constant 0 : index
      %73 = vector.load %arg18[%c0_54, %c0_55] : memref<32x4xf32, #tpu.memory_space<vmem>>, vector<32x4xf32>
      %cst_56 = arith.constant dense<0.000000e+00> : vector<8x4xf32>
      %74 = tpu.matmul %68, %73, %cst_56 {dimension_numbers = #tpu.dot_dimension_numbers<[1], [0], [0], [1], [0, 0, 1, 1], [], []>} : vector<8x32xf32>, vector<32x4xf32>, vector<8x4xf32> -> vector<8x4xf32>
      %c0_57 = arith.constant 0 : index
      %c0_58 = arith.constant 0 : index
      %75 = vector.load %arg19[%c0_57, %c0_58] : memref<1x4xf32, #tpu.memory_space<vmem>>, vector<1x4xf32>
      %76 = vector.broadcast %75 : vector<1x4xf32> to vector<8x4xf32>
      %77 = arith.addf %74, %76 : vector<8x4xf32>
      %c0_59 = arith.constant 0 : index
      %c0_60 = arith.constant 0 : index
      %78 = vector.load %arg20[%c0_59, %c0_60] : memref<8x4xf32, #tpu.memory_space<vmem>>, vector<8x4xf32>
      tpu.vector_store %arg20[%c0_59, %c0_60], %77 {strides = array<i32>} : memref<8x4xf32, #tpu.memory_space<vmem>>, vector<8x4xf32>,
    } else {
    }
    return
  }
  func.func @transform_0(%arg0: i32) -> (i32, i32) {
    %c0_i32 = arith.constant 0 : i32
    %c0_i32_0 = arith.constant 0 : i32
    %c0_i32_1 = arith.constant 0 : i32
    return %c0_i32, %c0_i32_0 : i32, i32
  }
  func.func @transform_1(%arg0: i32) -> (i32, i32) {
    %c0_i32 = arith.constant 0 : i32
    %c0_i32_0 = arith.constant 0 : i32
    %c0_i32_1 = arith.constant 0 : i32
    return %c0_i32, %c0_i32_0 : i32, i32
  }
  func.func @transform_2(%arg0: i32) -> (i32, i32) {
    %c0_i32 = arith.constant 0 : i32
    %c0_i32_0 = arith.constant 0 : i32
    %c0_i32_1 = arith.constant 0 : i32
    return %c0_i32, %c0_i32_0 : i32, i32
  }
  func.func @transform_3(%arg0: i32) -> (i32, i32) {
    %c0_i32 = arith.constant 0 : i32
    %c0_i32_0 = arith.constant 0 : i32
    %c0_i32_1 = arith.constant 0 : i32
    return %c0_i32, %c0_i32_0 : i32, i32
  }
  func.func @transform_4(%arg0: i32) -> (i32, i32) {
    %c0_i32 = arith.constant 0 : i32
    %c0_i32_0 = arith.constant 0 : i32
    %c0_i32_1 = arith.constant 0 : i32
    return %c0_i32, %c0_i32_0 : i32, i32
  }
  func.func @transform_5(%arg0: i32) -> (i32, i32) {
    %c0_i32 = arith.constant 0 : i32
    %c0_i32_0 = arith.constant 0 : i32
    %c0_i32_1 = arith.constant 0 : i32
    return %c0_i32, %c0_i32_0 : i32, i32
  }
  func.func @transform_6(%arg0: i32) -> (i32, i32) {
    %c0_i32 = arith.constant 0 : i32
    %c0_i32_0 = arith.constant 0 : i32
    %c0_i32_1 = arith.constant 0 : i32
    return %c0_i32, %c0_i32_0 : i32, i32
  }
  func.func @transform_7(%arg0: i32) -> (i32, i32, i32) {
    %c0_i32 = arith.constant 0 : i32
    %c0_i32_0 = arith.constant 0 : i32
    %c0_i32_1 = arith.constant 0 : i32
    return %arg0, %c0_i32, %c0_i32_0 : i32, i32, i32
  }
  func.func @transform_8(%arg0: i32) -> (i32, i32, i32) {
    %c0_i32 = arith.constant 0 : i32
    %c0_i32_0 = arith.constant 0 : i32
    %c0_i32_1 = arith.constant 0 : i32
    return %arg0, %c0_i32, %c0_i32_0 : i32, i32, i32
  }
  func.func @transform_9(%arg0: i32) -> (i32, i32, i32) {
    %c0_i32 = arith.constant 0 : i32
    %c0_i32_0 = arith.constant 0 : i32
    %c0_i32_1 = arith.constant 0 : i32
    return %arg0, %c0_i32, %c0_i32_0 : i32, i32, i32
  }
  func.func @transform_10(%arg0: i32) -> (i32, i32, i32) {
    %c0_i32 = arith.constant 0 : i32
    %c0_i32_0 = arith.constant 0 : i32
    %c0_i32_1 = arith.constant 0 : i32
    return %arg0, %c0_i32, %c0_i32_0 : i32, i32, i32
  }
  func.func @transform_11(%arg0: i32) -> (i32, i32, i32) {
    %c0_i32 = arith.constant 0 : i32
    %c0_i32_0 = arith.constant 0 : i32
    %c0_i32_1 = arith.constant 0 : i32
    return %arg0, %c0_i32, %c0_i32_0 : i32, i32, i32
  }
  func.func @transform_12(%arg0: i32) -> (i32, i32, i32) {
    %c0_i32 = arith.constant 0 : i32
    %c0_i32_0 = arith.constant 0 : i32
    %c0_i32_1 = arith.constant 0 : i32
    return %arg0, %c0_i32, %c0_i32_0 : i32, i32, i32
  }
  func.func @transform_13(%arg0: i32) -> (i32, i32, i32) {
    %c0_i32 = arith.constant 0 : i32
    %c0_i32_0 = arith.constant 0 : i32
    %c0_i32_1 = arith.constant 0 : i32
    return %arg0, %c0_i32, %c0_i32_0 : i32, i32, i32
  }
  func.func @transform_14(%arg0: i32) -> (i32, i32, i32) {
    %c0_i32 = arith.constant 0 : i32
    %c0_i32_0 = arith.constant 0 : i32
    %c0_i32_1 = arith.constant 0 : i32
    return %arg0, %c0_i32, %c0_i32_0 : i32, i32, i32
  }
  func.func @transform_15(%arg0: i32) -> (i32, i32, i32) {
    %c0_i32 = arith.constant 0 : i32
    %c0_i32_0 = arith.constant 0 : i32
    %c0_i32_1 = arith.constant 0 : i32
    return %arg0, %c0_i32, %c0_i32_0 : i32, i32, i32
  }
  func.func @transform_16(%arg0: i32) -> (i32, i32, i32) {
    %c0_i32 = arith.constant 0 : i32
    %c0_i32_0 = arith.constant 0 : i32
    %c0_i32_1 = arith.constant 0 : i32
    return %arg0, %c0_i32, %c0_i32_0 : i32, i32, i32
  }
  func.func @transform_17(%arg0: i32) -> (i32, i32) {
    %c0_i32 = arith.constant 0 : i32
    %c0_i32_0 = arith.constant 0 : i32
    %c0_i32_1 = arith.constant 0 : i32
    return %c0_i32, %c0_i32_0 : i32, i32
  }
  func.func @transform_18(%arg0: i32) -> (i32, i32) {
    %c0_i32 = arith.constant 0 : i32
    %c0_i32_0 = arith.constant 0 : i32
    %c0_i32_1 = arith.constant 0 : i32
    return %c0_i32, %c0_i32_0 : i32, i32
  }
  func.func @transform_19(%arg0: i32) -> (i32, i32) {
    %c0_i32 = arith.constant 0 : i32
    %c0_i32_0 = arith.constant 0 : i32
    %c0_i32_1 = arith.constant 0 : i32
    return %c0_i32, %c0_i32_0 : i32, i32
  }
}

</mosaic_0001>

<bundles_post_ra>
// kernel: gnn_forward.1
= control target key start
LH: loop header
LB: loop body
LE: loop exit
PB: predicated region body
PF: predicated region fallthrough
CT: control target
= control target key end

     0   :  { %s4205_s0 = inlined_call_operand.vmem [shape: f32[8,4], index: 0, kind: input, shape index: {}]   ;;  %s4206_s1 = inlined_call_operand.vmem [shape: f32[56,2], index: 1, kind: input, shape index: {}]   ;;  %s4207_s2 = inlined_call_operand.vmem [shape: s32[56,1], index: 2, kind: input, shape index: {}]   ;;  %s4208_s3 = inlined_call_operand.vmem [shape: s32[1,56], index: 3, kind: input, shape index: {}]   ;;  %s4209_s4 = inlined_call_operand.vmem [shape: s32[56,1], index: 4, kind: input, shape index: {}]   ;;  %s4210_s5 = inlined_call_operand.hbm [shape: f32[4,32], index: 5, kind: input, shape index: {}]   ;;  %s4211_s6 = inlined_call_operand.hbm [shape: f32[1,32], index: 6, kind: input, shape index: {}]   ;;  %s4212_s7 = inlined_call_operand.vmem [shape: f32[4,32,64], index: 7, kind: input, shape index: {}]   ;;  %s4213_s8 = inlined_call_operand.vmem [shape: f32[4,2,32], index: 8, kind: input, shape index: {}]   ;;  %s4214_s9 = inlined_call_operand.hbm [shape: f32[4,1,32], index: 9, kind: input, shape index: {}]   ;;  %s4215_s10 = inlined_call_operand.vmem [shape: f32[4,32,32], index: 10, kind: input, shape index: {}]   ;;  %s4216_s11 = inlined_call_operand.hbm [shape: f32[4,1,32], index: 11, kind: input, shape index: {}]   ;;  %s4217_s12 = inlined_call_operand.hbm [shape: f32[4,32,32], index: 12, kind: input, shape index: {}]   ;;  %s4218_s13 = inlined_call_operand.hbm [shape: f32[4,32,32], index: 13, kind: input, shape index: {}]   ;;  %s4219_s14 = inlined_call_operand.hbm [shape: f32[4,1,32], index: 14, kind: input, shape index: {}]   ;;  %s4220_s15 = inlined_call_operand.hbm [shape: f32[4,32,32], index: 15, kind: input, shape index: {}]   ;;  %s4221_s16 = inlined_call_operand.hbm [shape: f32[4,1,32], index: 16, kind: input, shape index: {}]   ;;  %s4222_s17 = inlined_call_operand.vmem [shape: f32[32,4], index: 17, kind: input, shape index: {}]   ;;  %s4223_s18 = inlined_call_operand.hbm [shape: f32[1,4], index: 18, kind: input, shape index: {}]   ;;  %s4224_s19 = inlined_call_operand.vmem [shape: f32[8,4], index: 19, kind: output, shape index: {}]  }
   0x1   :  { %4246 = sst [smem:[#allocation26_spill]] %s4205_s0 }
   0x2   :  { %4247 = sst [smem:[#allocation27_spill]] %s4206_s1 }
   0x3   :  { %4248 = sst [smem:[#allocation28_spill]] %s4207_s2 }
   0x4   :  { %4249 = sst [smem:[#allocation29_spill]] %s4208_s3 }
   0x5   :  { %4250 = sst [smem:[#allocation30_spill]] %s4209_s4 }
   0x6   :  { %4251 = sst [smem:[#allocation31_spill]] %s4210_s5 }
   0x7   :  { %4252 = sst [smem:[#allocation32_spill]] %s4212_s7 }
   0x8   :  { %4253 = sst [smem:[#allocation33_spill]] %s4213_s8 }
   0x9   :  { %4254 = sst [smem:[#allocation34_spill]] %s4214_s9 }
   0xa   :  { %4255 = sst [smem:[#allocation35_spill]] %s4215_s10 }
   0xb   :  { %4256 = sst [smem:[#allocation36_spill]] %s4216_s11 }
   0xc   :  { %4257 = sst [smem:[#allocation37_spill]] %s4222_s17 }
   0xd   :  { %4258 = sst [smem:[#allocation38_spill]] %s4224_s19 }
   0xe   :  { %24 = vsyncpa [#allocation7], 0 }
   0xf   :  { %25 = vsyncpa [#allocation9], 0  ;;  %s3514_s0 = smov 0   ;;  %s3516_s30 = smov 0  }
  0x10   :  { %s3518_s20 = smov 0   ;;  %s3520_s21 = smov 0  }
  0x11 LB: > { %4259 = sst [smem:[#allocation22_spill]] %s3386_s20  ;;  %s3533_s1 = sadd.s32 4294967295, %s3390_s21   ;;  %s3390_s21 = sphi %s3520_s21, %s4306_s21   ;;  %s3386_s20 = sphi %s3518_s20, %s4308_s20   ;;  %s3382_s30 = sphi %s3516_s30, %s4310_s30   ;;  %s3378_s0 = sphi %s3514_s0, %s4309_s0  }
  0x12   : > { %s3536_s22 = sadd.s32 1, %s3390_s21   ;;  %s237_s23 = sadd.s32 1, %s3386_s20 }
  0x13   : > { %4260 = sst [smem:[#allocation23_spill]] %s3536_s22  ;;  %s234_s2 = ssub.s32 %s3390_s21, %s3536_s22 }
  0x14   : > { %p235_p0 = scmp.eq.s32.totalorder %s234_s2, 0  ;;  %p244_p1 = scmp.ne.s32.totalorder %s3386_s20, %s3382_s30 }
  0x15   : > { %p245_p2 = scmp.eq.s32.totalorder %s3390_s21, 0  ;;  %p250_p3 = scmp.ne.s32.totalorder %s3382_s30, %s3378_s0 }
  0x16   : > { %s3546_s24 = scalar_select %p235_p0, %s3386_s20, %s237_s23  }
  0x17   : > { %p3548_p4 = por %p245_p2, %p244_p1  ;;  %p4232_p5 = scmp.eq.s32.totalorder %s3533_s1, 0 }
  0x18   : > { %4261 = sst [smem:[#allocation24_spill]] %s3546_s24  ;;  %p2473_p6 = scmp.ge.s32.totalorder %s3390_s21, 1 }
  0x19   : > { %p506_p7 = scmp.lt.s32.totalorder %s3390_s21, 5  ;;  %p3557_p8 = por %p4232_p5, %p250_p3 }
  0x1a   : > { %s3392_s27 = smov [#allocation6]   ;;  %p2937_p12 = scmp.lt.s32.totalorder %s3390_s21, 4 }
  0x1b   : > { %s4263_s3 = scalar_select %p3557_p8, 1, 0 }
  0x1c   : > { %p3562_p10 = pnand %p2473_p6, %p506_p7  ;;  %s534_s28 = sshll.u32 %s3392_s27, 4  ;;  %s535_s28 = int_to_ptr.vmem [resolvable:$true] %s534_s28 }
  0x1d   : > { %4264 = sst [smem:[#allocation25_spill]] %s4263_s3  ;;  %s585_s29 = sand.u32 1, %s3390_s21  }
  0x1e   : > { %s4265_s26 = scalar_select %p3562_p10, 1, 0 }
  0x1f   : > { %p2902_p11 = pneg %p3562_p10  ;;  %p3578_p0 = pnand %p2937_p12, %p3548_p4 }
  0x20   : > { %s3583_s23 = sand.u32 1, %s3386_s20   ;;  %s4268_s5 = sld [smem:[#allocation31_spill]] }
  0x21   : > { %p3572_p13 = pnand %p2902_p11, %p4232_p5 }
  0x22   : > { %s4267_s2 = scalar_select %p3578_p0, 1, 0 }
  0x23   : > { %s4266_s0 = scalar_select %p3572_p13, 1, 0 }
  0x24   : > { %p3593_p2 = pneg %p3572_p13 }
  0x26   : > { %s3050_s22 = scalar_lea.hbm %s4268_s5, 64 }
  0x27   : > { %p3051_p1 = scmp.ne.s32.totalorder %s4268_s5, %s3050_s22  ;;  %p3057_p6 = scmp.lt.u32.totalorder %s3050_s22, %s4268_s5 }
  0x28   : > { %s4269_s4 = scalar_select %p3593_p2, 1, 0 }
  0x29   : > { %p3053_p3 = pnand %p3593_p2, %p3051_p1 }
  0x2b   : > { %p3054_p4 = pneg %p3053_p3 }
  0x2d   : > { %p3059_p7 = pnand %p3057_p6, %p3054_p4 }
  0x2f   : > { %3062 = shalt.err (!%p3059_p7)
}
  0x30   : > { %s3063_s24 = scalar_lea.vmem %s535_s28, 64  ;;  %p3071_p5 = scmp.lt.s32.totalorder %s535_s28, %s535_s28 }
  0x31   : > { %p3064_p11 = scmp.ne.s32.totalorder %s535_s28, %s3063_s24  ;;  %p3072_p8 = scmp.lt.s32.totalorder %s3063_s24, %s3063_s24 }
  0x33   : > { %p3066_p12 = pnand %p3064_p11, %p3593_p2  ;;  %p3073_p10 = por %p3072_p8, %p3071_p5 }
  0x35   : > { %p3067_p9 = pneg %p3066_p12 }
  0x37   : > { %p3074_p0 = pnand %p3073_p10, %p3067_p9 }
  0x39   : > { %3077 = shalt.err (!%p3074_p0)
}
  0x3a   : > { %2905 = dma.hbm_to_vmem [thread:$0]  (!%p3572_p13), %s4268_s5, 64, %s535_s28, [#allocation7]  }
  0x3b   : > { %s3610_s20 = sshll.u32 %s3390_s21, 4  ;;  %s4270_s9 = sld [smem:[#allocation34_spill]] }
  0x3c   : > { %s588_s24 = scalar_lea.vmem [#allocation10], %s3583_s23  ;;  %s3621_s17 = scalar_lea.sflag [#allocation7], %s585_s29 }
  0x3d   : > { %s595_s10 = sshll.u32 %s588_s24, 4  ;;  %p4271_p8 = scmp.ne.s32.totalorder %s4267_s2, 0  ;;  %s3619_s10 = int_to_ptr.vmem [resolvable:$true] %s595_s10 }
  0x3f   : > { %p3627_p9 = pneg %p4271_p8 }
  0x41   : > { %s3616_s25 = scalar_lea.hbm %s4270_s9, %s3610_s20  ;;  %s3083_s5 = scalar_lea.hbm %s4270_s9, 64 }
  0x42   : > { %s3078_s19 = scalar_lea.hbm %s3616_s25, 16  ;;  %p3084_p1 = scmp.lt.u32.totalorder %s3616_s25, %s4270_s9 }
  0x43   : > { %p3079_p5 = scmp.ne.s32.totalorder %s3616_s25, %s3078_s19  ;;  %p3085_p3 = scmp.lt.u32.totalorder %s3083_s5, %s3078_s19 }
  0x44   : > { %p3087_p6 = scmp.lt.u32.totalorder %s3078_s19, %s3616_s25 }
  0x45   : > { %p3081_p10 = pnand %p3627_p9, %p3079_p5  ;;  %p3086_p4 = por %p3085_p3, %p3084_p1 }
  0x47   : > { %p3082_p0 = pneg %p3081_p10  ;;  %p3088_p7 = por %p3087_p6, %p3086_p4 }
  0x49   : > { %p3089_p11 = pnand %p3088_p7, %p3082_p0 }
  0x4b   : > { %3092 = shalt.err (!%p3089_p11)
}
  0x4c   : > { %s3093_s29 = scalar_lea.vmem %s3619_s10, 16  ;;  %s3393_s22 = smov [#allocation10]  }
  0x4d   : > { %p3094_p12 = scmp.ne.s32.totalorder %s3619_s10, %s3093_s29  ;;  %s3098_s27 = sshll.u32 %s3393_s22, 4  ;;  %s3099_s27 = int_to_ptr.vmem [resolvable:$false] %s3098_s27 }
  0x4e   : > { %s3100_s8 = scalar_lea.vmem %s3099_s27, 32  ;;  %p3101_p13 = scmp.lt.s32.totalorder %s3619_s10, %s3099_s27 }
  0x4f   : > { %p3096_p5 = pnand %p3094_p12, %p3627_p9  ;;  %p3102_p2 = scmp.lt.s32.totalorder %s3100_s8, %s3093_s29 }
  0x51   : > { %p3097_p10 = pneg %p3096_p5  ;;  %p3103_p1 = por %p3102_p2, %p3101_p13 }
  0x53   : > { %p3104_p3 = pnand %p3103_p1, %p3097_p10 }
  0x55   : > { %3107 = shalt.err (!%p3104_p3)
}
  0x56   : > { %2915 = dma.hbm_to_vmem [thread:$0]  (!%p4271_p8), %s3616_s25, 16, %s3619_s10, %s3621_s17  }
  0x57   : > { %s4273_s11 = sld [smem:[#allocation36_spill]]  ;;  %s613_s29 = scalar_lea.vmem [#allocation11], %s3583_s23 }
  0x58   : > { %s620_s22 = sshll.u32 %s613_s29, 4  ;;  %s3659_s27 = sshll.u32 %s3583_s23, 5  ;;  %s621_s22 = int_to_ptr.vmem [resolvable:$true] %s620_s22 }
  0x5d   : > { %s3655_s24 = scalar_lea.hbm %s4273_s11, %s3610_s20  ;;  %s3113_s5 = scalar_lea.hbm %s4273_s11, 64 }
  0x5e   : > { %s3108_s8 = scalar_lea.hbm %s3655_s24, 16  ;;  %p3114_p4 = scmp.lt.u32.totalorder %s3655_s24, %s4273_s11 }
  0x5f   : > { %p3109_p13 = scmp.ne.s32.totalorder %s3655_s24, %s3108_s8  ;;  %p3115_p6 = scmp.lt.u32.totalorder %s3113_s5, %s3108_s8 }
  0x60   : > { %p3117_p11 = scmp.lt.u32.totalorder %s3108_s8, %s3655_s24 }
  0x61   : > { %p3111_p2 = pnand %p3109_p13, %p3627_p9  ;;  %p3116_p7 = por %p3115_p6, %p3114_p4 }
  0x63   : > { %p3112_p0 = pneg %p3111_p2  ;;  %p3118_p12 = por %p3117_p11, %p3116_p7 }
  0x65   : > { %p3119_p5 = pnand %p3118_p12, %p3112_p0 }
  0x67   : > { %3122 = shalt.err (!%p3119_p5)
}
  0x68   : > { %s3123_s29 = scalar_lea.vmem %s621_s22, 16  ;;  %s3394_s7 = smov [#allocation11]  }
  0x69   : > { %p3124_p10 = scmp.ne.s32.totalorder %s621_s22, %s3123_s29  ;;  %s3128_s3 = sshll.u32 %s3394_s7, 4  ;;  %s3129_s3 = int_to_ptr.vmem [resolvable:$false] %s3128_s3 }
  0x6a   : > { %s3130_s10 = scalar_lea.vmem %s3129_s3, 32  ;;  %p3131_p13 = scmp.lt.s32.totalorder %s621_s22, %s3129_s3 }
  0x6b   : > { %p3126_p1 = pnand %p3124_p10, %p3627_p9  ;;  %p3132_p2 = scmp.lt.s32.totalorder %s3130_s10, %s3123_s29 }
  0x6d   : > { %p3127_p3 = pneg %p3126_p1  ;;  %p3133_p8 = por %p3132_p2, %p3131_p13 }
  0x6f   : > { %p3134_p4 = pnand %p3133_p8, %p3127_p3 }
  0x71   : > { %3137 = shalt.err (!%p3134_p4)
}
  0x72   : > { %p4274_p6 = scmp.ne.s32.totalorder %s4267_s2, 0  ;;  %s3680_s9 = sshll.u32 %s3390_s21, 9 }
  0x73   : > { %s3686_s25 = scalar_lea.hbm %s4217_s12, %s3680_s9  ;;  %s631_s3 = scalar_lea.vmem [#allocation12], %s3659_s27 }
  0x74   : > { %2918 = dma.hbm_to_vmem [thread:$0]  (!%p4274_p6), %s3655_s24, 16, %s621_s22, %s3621_s17  }
  0x75   : > { %s638_s5 = sshll.u32 %s631_s3, 4  ;;  %s3138_s19 = scalar_lea.hbm %s3686_s25, 512  ;;  %s3689_s5 = int_to_ptr.vmem [resolvable:$true] %s638_s5 }
  0x76   : > { %p3139_p8 = scmp.ne.s32.totalorder %s3686_s25, %s3138_s19  ;;  %s3143_s22 = scalar_lea.hbm %s4217_s12, 2048 }
  0x77   : > { %p3144_p11 = scmp.lt.u32.totalorder %s3686_s25, %s4217_s12  ;;  %p3145_p12 = scmp.lt.u32.totalorder %s3143_s22, %s3138_s19 }
  0x78   : > { %p3141_p0 = pnand %p3139_p8, %p3627_p9  ;;  %p3147_p10 = scmp.lt.u32.totalorder %s3138_s19, %s3686_s25 }
  0x79   : > { %p3146_p5 = por %p3145_p12, %p3144_p11 }
  0x7a   : > { %p3142_p7 = pneg %p3141_p0 }
  0x7b   : > { %p3148_p1 = por %p3147_p10, %p3146_p5 }
  0x7d   : > { %p3149_p3 = pnand %p3148_p1, %p3142_p7 }
  0x7f   : > { %3152 = shalt.err (!%p3149_p3)
}
  0x80   : > { %s3153_s8 = scalar_lea.vmem %s3689_s5, 512  ;;  %s3395_s7 = smov [#allocation12]  }
  0x81   : > { %p3154_p13 = scmp.ne.s32.totalorder %s3689_s5, %s3153_s8  ;;  %s3158_s3 = sshll.u32 %s3395_s7, 4  ;;  %s3159_s3 = int_to_ptr.vmem [resolvable:$false] %s3158_s3 }
  0x82   : > { %s3160_s21 = scalar_lea.vmem %s3159_s3, 1024  ;;  %p3161_p8 = scmp.lt.s32.totalorder %s3689_s5, %s3159_s3 }
  0x83   : > { %p3156_p2 = pnand %p3154_p13, %p3627_p9  ;;  %p3162_p0 = scmp.lt.s32.totalorder %s3160_s21, %s3153_s8 }
  0x85   : > { %p3157_p4 = pneg %p3156_p2  ;;  %p3163_p11 = por %p3162_p0, %p3161_p8 }
  0x87   : > { %p3164_p12 = pnand %p3163_p11, %p3157_p4 }
  0x89   : > { %3167 = shalt.err (!%p3164_p12)
}
  0x8a   : > { %s4243_s19 = smov 128   ;;  %s4245_s24 = smov 8  }
  0x8b   : > { %2921 = dma.hbm_to_vmem [thread:$0]  (!%p4274_p6), %s3686_s25, 512, %s3689_s5, %s3621_s17, %s4243_s19, %s4243_s19, %s4245_s24  }
  0x8c   : > { %s3720_s10 = scalar_lea.hbm %s4218_s13, %s3680_s9  ;;  %s652_s8 = scalar_lea.vmem [#allocation13], %s3659_s27 }
  0x8d   : > { %s659_s7 = sshll.u32 %s652_s8, 4  ;;  %s3168_s3 = scalar_lea.hbm %s3720_s10, 512  ;;  %s3723_s7 = int_to_ptr.vmem [resolvable:$true] %s659_s7 }
  0x8e   : > { %p3169_p7 = scmp.ne.s32.totalorder %s3720_s10, %s3168_s3  ;;  %s3173_s5 = scalar_lea.hbm %s4218_s13, 2048 }
  0x8f   : > { %p3174_p1 = scmp.lt.u32.totalorder %s3720_s10, %s4218_s13  ;;  %p3175_p3 = scmp.lt.u32.totalorder %s3173_s5, %s3168_s3 }
  0x90   : > { %p3171_p5 = pnand %p3169_p7, %p3627_p9  ;;  %p3177_p2 = scmp.lt.u32.totalorder %s3168_s3, %s3720_s10 }
  0x91   : > { %p3176_p13 = por %p3175_p3, %p3174_p1 }
  0x92   : > { %p3172_p10 = pneg %p3171_p5 }
  0x93   : > { %p3178_p4 = por %p3177_p2, %p3176_p13 }
  0x95   : > { %p3179_p8 = pnand %p3178_p4, %p3172_p10 }
  0x97   : > { %3182 = shalt.err (!%p3179_p8)
}
  0x98   : > { %s3183_s8 = scalar_lea.vmem %s3723_s7, 512  ;;  %s3398_s21 = smov [#allocation13]  }
  0x99   : > { %p3184_p0 = scmp.ne.s32.totalorder %s3723_s7, %s3183_s8  ;;  %s3188_s25 = sshll.u32 %s3398_s21, 4  ;;  %s3189_s25 = int_to_ptr.vmem [resolvable:$false] %s3188_s25 }
  0x9a   : > { %s3190_s22 = scalar_lea.vmem %s3189_s25, 1024  ;;  %p3191_p7 = scmp.lt.s32.totalorder %s3723_s7, %s3189_s25 }
  0x9b   : > { %p3186_p11 = pnand %p3184_p0, %p3627_p9  ;;  %p3192_p5 = scmp.lt.s32.totalorder %s3190_s22, %s3183_s8 }
  0x9d   : > { %p3187_p12 = pneg %p3186_p11  ;;  %p3193_p1 = por %p3192_p5, %p3191_p7 }
  0x9f   : > { %p3194_p3 = pnand %p3193_p1, %p3187_p12 }
  0xa1   : > { %3197 = shalt.err (!%p3194_p3)
}
  0xa2   : > { %2924 = dma.hbm_to_vmem [thread:$0]  (!%p4274_p6), %s3720_s10, 512, %s3723_s7, %s3621_s17, %s4243_s19, %s4243_s19, %s4245_s24  }
  0xa3   : > { %s3754_s29 = scalar_lea.hbm %s4219_s14, %s3610_s20  ;;  %s672_s8 = scalar_lea.vmem [#allocation14], %s3583_s23 }
  0xa4   : > { %s679_s21 = sshll.u32 %s672_s8, 4  ;;  %s3198_s25 = scalar_lea.hbm %s3754_s29, 16  ;;  %s680_s21 = int_to_ptr.vmem [resolvable:$true] %s679_s21 }
  0xa5   : > { %p3199_p10 = scmp.ne.s32.totalorder %s3754_s29, %s3198_s25  ;;  %s3203_s10 = scalar_lea.hbm %s4219_s14, 64 }
  0xa6   : > { %p3204_p4 = scmp.lt.u32.totalorder %s3754_s29, %s4219_s14  ;;  %p3205_p8 = scmp.lt.u32.totalorder %s3203_s10, %s3198_s25 }
  0xa7   : > { %p3201_p13 = pnand %p3199_p10, %p3627_p9  ;;  %p3207_p11 = scmp.lt.u32.totalorder %s3198_s25, %s3754_s29 }
  0xa8   : > { %p3206_p0 = por %p3205_p8, %p3204_p4 }
  0xa9   : > { %p3202_p2 = pneg %p3201_p13 }
  0xaa   : > { %p3208_p12 = por %p3207_p11, %p3206_p0 }
  0xac   : > { %p3209_p7 = pnand %p3208_p12, %p3202_p2 }
  0xae   : > { %3212 = shalt.err (!%p3209_p7)
}
  0xaf   : > { %s3213_s5 = scalar_lea.vmem %s680_s21, 16  ;;  %s3399_s8 = smov [#allocation14]  }
  0xb0   : > { %p3214_p5 = scmp.ne.s32.totalorder %s680_s21, %s3213_s5  ;;  %s3218_s19 = sshll.u32 %s3399_s8, 4  ;;  %s3219_s19 = int_to_ptr.vmem [resolvable:$false] %s3218_s19 }
  0xb1   : > { %s3220_s11 = scalar_lea.vmem %s3219_s19, 32  ;;  %p3221_p10 = scmp.lt.s32.totalorder %s680_s21, %s3219_s19 }
  0xb2   : > { %p3216_p1 = pnand %p3214_p5, %p3627_p9  ;;  %p3222_p13 = scmp.lt.s32.totalorder %s3220_s11, %s3213_s5 }
  0xb4   : > { %p3217_p3 = pneg %p3216_p1  ;;  %p3223_p6 = por %p3222_p13, %p3221_p10 }
  0xb6   : > { %p3224_p4 = pnand %p3223_p6, %p3217_p3 }
  0xb8   : > { %3227 = shalt.err (!%p3224_p4)
}
  0xb9   : > { %p4275_p8 = scmp.ne.s32.totalorder %s4267_s2, 0  ;;  %s3400_s25 = smov [#allocation8]  }
  0xba   : > { %s545_s22 = sshll.u32 %s3400_s25, 4  ;;  %s3779_s3 = scalar_lea.hbm %s4220_s15, %s3680_s9  ;;  %s546_s22 = int_to_ptr.vmem [resolvable:$true] %s545_s22 }
  0xbb   : > { %2927 = dma.hbm_to_vmem [thread:$0]  (!%p4275_p8), %s3754_s29, 16, %s680_s21, %s3621_s17  }
  0xbc   : > { %s3228_s8 = scalar_lea.hbm %s4211_s6, 16  ;;  %p4276_p2 = scmp.ne.s32.totalorder %s4269_s4, 0 }
  0xbd   : > { %p3229_p6 = scmp.ne.s32.totalorder %s4211_s6, %s3228_s8  ;;  %p3235_p12 = scmp.lt.u32.totalorder %s3228_s8, %s4211_s6 }
  0xbf   : > { %p3231_p0 = pnand %p3229_p6, %p4276_p2 }
  0xc1   : > { %p3232_p11 = pneg %p3231_p0 }
  0xc3   : > { %p3237_p7 = pnand %p3235_p12, %p3232_p11 }
  0xc5   : > { %3240 = shalt.err (!%p3237_p7)
}
  0xc6   : > { %s3241_s25 = scalar_lea.vmem %s546_s22, 16  ;;  %s3248_s9 = scalar_lea.vmem %s546_s22, 32 }
  0xc7   : > { %p3242_p5 = scmp.ne.s32.totalorder %s546_s22, %s3241_s25  ;;  %p3249_p10 = scmp.lt.s32.totalorder %s546_s22, %s546_s22 }
  0xc8   : > { %p3250_p13 = scmp.lt.s32.totalorder %s3248_s9, %s3241_s25 }
  0xc9   : > { %p3244_p1 = pnand %p3242_p5, %p4276_p2 }
  0xca   : > { %p3251_p4 = por %p3250_p13, %p3249_p10 }
  0xcb   : > { %p3245_p3 = pneg %p3244_p1 }
  0xcd   : > { %p3252_p8 = pnand %p3251_p4, %p3245_p3 }
  0xcf   : > { %3255 = shalt.err (!%p3252_p8)
}
  0xd0   : > { %p4277_p6 = scmp.ne.s32.totalorder %s4266_s0, 0  ;;  %s690_s7 = scalar_lea.vmem [#allocation15], %s3659_s27 }
  0xd1   : > { %s697_s19 = sshll.u32 %s690_s7, 4  ;;  %s3401_s5 = smov [#allocation17]   ;;  %s3800_s19 = int_to_ptr.vmem [resolvable:$true] %s697_s19 }
  0xd2   : > { %2908 = dma.hbm_to_vmem [thread:$0]  (!%p4277_p6), %s4211_s6, 16, %s546_s22, [#allocation9]  }
  0xd3   : > { %s3802_s8 = sshll.u32 %s3401_s5, 4  ;;  %s3256_s11 = scalar_lea.hbm %s3779_s3, 512  ;;  %s560_s8 = int_to_ptr.vmem [resolvable:$true] %s3802_s8 }
  0xd4   : > { %p3257_p8 = scmp.ne.s32.totalorder %s3779_s3, %s3256_s11  ;;  %s3261_s25 = scalar_lea.hbm %s4220_s15, 2048 }
  0xd5   : > { %p3262_p12 = scmp.lt.u32.totalorder %s3779_s3, %s4220_s15  ;;  %p3263_p7 = scmp.lt.u32.totalorder %s3261_s25, %s3256_s11 }
  0xd6   : > { %p3259_p0 = pnand %p3257_p8, %p3627_p9  ;;  %p3265_p1 = scmp.lt.u32.totalorder %s3256_s11, %s3779_s3 }
  0xd7   : > { %p3264_p5 = por %p3263_p7, %p3262_p12 }
  0xd8   : > { %p3260_p11 = pneg %p3259_p0 }
  0xd9   : > { %p3266_p3 = por %p3265_p1, %p3264_p5 }
  0xdb   : > { %p3267_p10 = pnand %p3266_p3, %p3260_p11 }
  0xdd   : > { %3270 = shalt.err (!%p3267_p10)
}
  0xde   : > { %s3271_s27 = scalar_lea.vmem %s3800_s19, 512  ;;  %s3402_s22 = smov [#allocation15]  }
  0xdf   : > { %p3272_p13 = scmp.ne.s32.totalorder %s3800_s19, %s3271_s27  ;;  %s3276_s10 = sshll.u32 %s3402_s22, 4  ;;  %s3277_s10 = int_to_ptr.vmem [resolvable:$false] %s3276_s10 }
  0xe0   : > { %s3278_s7 = scalar_lea.vmem %s3277_s10, 1024  ;;  %p3279_p0 = scmp.lt.s32.totalorder %s3800_s19, %s3277_s10 }
  0xe1   : > { %p3274_p4 = pnand %p3272_p13, %p3627_p9  ;;  %p3280_p6 = scmp.lt.s32.totalorder %s3278_s7, %s3271_s27 }
  0xe3   : > { %p3275_p8 = pneg %p3274_p4  ;;  %p3281_p12 = por %p3280_p6, %p3279_p0 }
  0xe5   : > { %p3282_p7 = pnand %p3281_p12, %p3275_p8 }
  0xe7   : > { %3285 = shalt.err (!%p3282_p7)
}
  0xe8   : > { %p4278_p11 = scmp.ne.s32.totalorder %s4267_s2, 0  ;;  %s4279_s5 = smov 8  }
  0xe9   : > { %s4280_s11 = smov 128   ;;  %s3286_s25 = scalar_lea.hbm %s4223_s18, 16 }
  0xea   : > { %2930 = dma.hbm_to_vmem [thread:$0]  (!%p4278_p11), %s3779_s3, 512, %s3800_s19, %s3621_s17, %s4280_s11, %s4280_s11, %s4279_s5  }
  0xeb   : > { %p3287_p6 = scmp.ne.s32.totalorder %s4223_s18, %s3286_s25  ;;  %p3293_p3 = scmp.lt.u32.totalorder %s3286_s25, %s4223_s18 }
  0xed   : > { %p3289_p5 = pnand %p3287_p6, %p4276_p2 }
  0xef   : > { %p3290_p1 = pneg %p3289_p5 }
  0xf1   : > { %p3295_p10 = pnand %p3293_p3, %p3290_p1 }
  0xf3   : > { %3298 = shalt.err (!%p3295_p10)
}
  0xf4   : > { %s3299_s10 = scalar_lea.vmem %s560_s8, 16  ;;  %s3306_s3 = scalar_lea.vmem %s560_s8, 32 }
  0xf5   : > { %p3300_p13 = scmp.ne.s32.totalorder %s560_s8, %s3299_s10  ;;  %p3307_p0 = scmp.lt.s32.totalorder %s560_s8, %s560_s8 }
  0xf6   : > { %p3308_p12 = scmp.lt.s32.totalorder %s3306_s3, %s3299_s10 }
  0xf7   : > { %p3302_p4 = pnand %p3300_p13, %p4276_p2 }
  0xf8   : > { %p3309_p7 = por %p3308_p12, %p3307_p0 }
  0xf9   : > { %p3303_p8 = pneg %p3302_p4 }
  0xfb   : > { %p3310_p11 = pnand %p3309_p7, %p3303_p8 }
  0xfd   : > { %3313 = shalt.err (!%p3310_p11)
}
  0xfe   : > { %p4281_p6 = scmp.ne.s32.totalorder %s4266_s0, 0  ;;  %s3852_s4 = scalar_lea.hbm %s4221_s16, %s3610_s20 }
  0xff   : > { %s710_s29 = scalar_lea.vmem [#allocation16], %s3583_s23  ;;  %s3314_s0 = scalar_lea.hbm %s3852_s4, 16 }
 0x100   : > { %2911 = dma.hbm_to_vmem [thread:$0]  (!%p4281_p6), %s4223_s18, 16, %s560_s8, [#allocation9]  }
 0x101   : > { %s717_s21 = sshll.u32 %s710_s29, 4  ;;  %p3315_p2 = scmp.ne.s32.totalorder %s3852_s4, %s3314_s0  ;;  %s718_s21 = int_to_ptr.vmem [resolvable:$true] %s717_s21 }
 0x102   : > { %s3319_s8 = scalar_lea.hbm %s4221_s16, 64  ;;  %p3320_p1 = scmp.lt.u32.totalorder %s3852_s4, %s4221_s16 }
 0x103   : > { %p3317_p11 = pnand %p3315_p2, %p3627_p9  ;;  %p3321_p3 = scmp.lt.u32.totalorder %s3319_s8, %s3314_s0 }
 0x104   : > { %p3323_p13 = scmp.lt.u32.totalorder %s3314_s0, %s3852_s4 }
 0x105   : > { %p3318_p5 = pneg %p3317_p11  ;;  %p3322_p10 = por %p3321_p3, %p3320_p1 }
 0x107   : > { %p3324_p4 = por %p3323_p13, %p3322_p10 }
 0x109   : > { %p3325_p8 = pnand %p3324_p4, %p3318_p5 }
 0x10b   : > { %3328 = shalt.err (!%p3325_p8)
}
 0x10c   : > { %s3329_s23 = scalar_lea.vmem %s718_s21, 16  ;;  %s3403_s20 = smov [#allocation16]  }
 0x10d   : > { %p3330_p0 = scmp.ne.s32.totalorder %s718_s21, %s3329_s23  ;;  %s3334_s22 = sshll.u32 %s3403_s20, 4  ;;  %s3335_s22 = int_to_ptr.vmem [resolvable:$false] %s3334_s22 }
 0x10e   : > { %s3336_s10 = scalar_lea.vmem %s3335_s22, 32  ;;  %p3337_p6 = scmp.lt.s32.totalorder %s718_s21, %s3335_s22 }
 0x10f   : > { %p3332_p12 = pnand %p3330_p0, %p3627_p9  ;;  %p3338_p2 = scmp.lt.s32.totalorder %s3336_s10, %s3329_s23 }
 0x111   : > { %p3333_p7 = pneg %p3332_p12  ;;  %p3339_p11 = por %p3338_p2, %p3337_p6 }
 0x113   : > { %p3340_p1 = pnand %p3339_p11, %p3333_p7 }
 0x115   : > { %3343 = shalt.err (!%p3340_p1)
}
 0x116   : > { %p4282_p3 = scmp.ne.s32.totalorder %s4267_s2, 0  ;;  %p4283_p5 = scmp.ne.s32.totalorder %s4265_s26, 0 }
 0x117   : > { %p4284_p9 = scmp.eq.s32.totalorder (!%p4283_p5), %s3533_s1, 0 }
 0x118   : > { %2933 = dma.hbm_to_vmem [thread:$0]  (!%p4282_p3), %s3852_s4, 16, %s718_s21, %s3621_s17  }
 0x119   : > { %726 = sbr.rel (%p4283_p5) target bundleno = 2304 (0x900), region = 96 }
 0x120   : > { %3361 = dma.done.wait (%p4284_p9), [#allocation7], 64   ;;  %p4285_p10 = pmov %p4284_p9 }
 0x121   : > { %p4286_p13 = pmov %p4284_p9 }
 0x122   : > { %3363 = vsyncadd (%p4285_p10), [#allocation7], 4294967232 }
 0x123   : > { %3365 = dma.done.wait (%p4286_p13), [#allocation9], 16   ;;  %p4287_p4 = pmov %p4284_p9 }
 0x124   : > { %s4288_s2 = sld [smem:[#allocation25_spill]]  ;;  %s736_s28 = sand.u32 1, %s3533_s1  }
 0x125   : > { %3367 = vsyncadd (%p4287_p4), [#allocation9], 4294967280  ;;  %s3885_s17 = sand.u32 1, %s3382_s30   ;;  %s737_s26 = scalar_lea.sflag [#allocation7], %s736_s28 }
 0x126   : > { %s739_s3 = scalar_lea.vmem [#allocation10], %s3885_s17 }
 0x12a   : > { %p4289_p8 = scmp.ne.s32.totalorder %s4288_s2, 0 }
 0x12c   : > { %3369 = dma.done.wait (%p4289_p8), %s737_s26, 1600  }
 0x12d   : > { %3371 = vsyncadd (%p4289_p8), %s737_s26, 4294965696  ;;  %s2494_s19 = sshll.u32 %s3885_s17, 5  ;;  %s747_s7 = scalar_lea.vmem [#allocation11], %s3885_s17 }
 0x12e   : > { %s3894_s5 = scalar_lea.vmem [#allocation12], %s2494_s19  ;;  %s3896_s11 = scalar_lea.vmem [#allocation13], %s2494_s19 }
 0x12f   : > { %s3899_s29 = scalar_lea.vmem [#allocation15], %s2494_s19  ;;  %p4290_p0 = pmov %p4287_p4 }
 0x131   : > { %3373 = dma.done.wait (%p4290_p0), [#allocation9], 16   ;;  %p4291_p12 = pmov %p4290_p0 }
 0x132   : > { %p884_p7 = scmp.lt.s32.totalorder %s3533_s1, 3  ;;  %s4292_s27 = sld [smem:[#allocation32_spill]] }
 0x133   : > { %3375 = vsyncadd (%p4291_p12), [#allocation9], 4294967280  ;;  %s4293_s10 = sld [smem:[#allocation33_spill]]  ;;  %s4294_s19 = sld [smem:[#allocation35_spill]] }
 0x134   : > { %s885_s0 = scalar_select %p884_p7, %s3533_s1, 3 }
 0x135   : > { %p4295_p6 = scmp.ne.s32.totalorder %s3533_s1, 0 }
 0x136   : > { %s2584_s25 = sshll.u32 %s885_s0, 5  ;;  %s2500_s9 = sshll.u32 %s885_s0, 1  ;;  %v903_v0 = vld [vmem:[#allocation6] sm:$0xf] (!%p4295_p6)  ;;  %vm915_vm0 = vcmask (!%p4295_p6), 1043456   ;;  %v3404_v2 = vmov (!%p4295_p6), 0.0   ;;  %v991_v6 = vlaneseq (!%p4295_p6) }
 0x137   : > { %901 = sbr.rel (%p4295_p6) target bundleno = 533 (0x215), region = 140  ;;  %s4296_s8 = sld [smem:[#allocation26_spill]] (!%p4295_p6)  ;;  %2656 = vmatprep.subr.mxu0 (!%p4295_p6), %v3404_v2  ;;  %vm3405_vm1 = vmmov (!%p4295_p6), 0   ;;  %vm911_vm2 = vcmask (!%p4295_p6), 31744   ;;  %v3406_v5 = vmov (!%p4295_p6), 0   ;;  %vm1116_vm3 = vcmask (!%p4295_p6), 457728  }
 0x138   : > { %s3911_s23 = scalar_lea.vmem %s4292_s27, %s2584_s25  ;;  %2658 = vmatprep.mubr.msk.f32.mxu0 (!%p4295_p6), %vm3405_vm1, %v3404_v2  ;;  %2657 = vmatpush3.msk.msra.mxu0 (!%p4295_p6), %vm915_vm0, %v903_v0  ;;  %s4298_s0 = sld [smem:[#allocation29_spill]] (!%p4295_p6)  ;;  %v1107_v10 = vshrl.u32 (!%p4295_p6), %v991_v6, 7  ;;  %v992_v22 = vand.u32 (!%p4295_p6), 127, %v991_v6  ;;  %vm1042_vm5 = vcmask (!%p4295_p6), 64512   ;;  %v2504_v51 = vld [vmem:[#allocation8] ss:$0 sm:$0xff] (!%p4295_p6) }
 0x139   : > { %s3916_s2 = scalar_lea.vmem %s4293_s10, %s2500_s9  ;;  %s3921_s21 = scalar_lea.vmem %s4294_s19, %s2584_s25  ;;  %2989 = vset.pattern.permute.xlu1 (!%p4295_p6), %v3406_v5  ;;  %2988 = vset.pattern.permute.xlu0 (!%p4295_p6), %v3406_v5 }
 0x13a   : > { %s4297_s25 = sld [smem:[#allocation28_spill]] (!%p4295_p6)  ;;  %s4299_s22 = sld [smem:[#allocation30_spill]] (!%p4295_p6) }
 0x13d   : > { %v902_v1 = vld [vmem:[%s4296_s8] sm:$0xff] (!%p4295_p6) }
 0x13e   : > { %2659 = vmatmul.mubr.msk.f32.vlgmr.msra.gmra.mrb[0].mxu0 %vm911_vm2, %v902_v1  ;;  %v2521_v9 = vld [vmem:[%s4298_s0] ss:$0 sm:$0xff] }
 0x13f   : > { %vm1113_vm4 = vcmp.eq.s32.totalorder %v1107_v10, %v2521_v9 }
 0x140   : > { %v995_v3 = vld [vmem:[%s4297_s25 + $0x10] sm:$0xff]  ;;  %v993_v4 = vld [vmem:[%s4297_s25] sm:$0xff]  ;;  %v996_v7 = vld [vmem:[%s4297_s25 + $0x18] sm:$0xff]  ;;  %v2522_v13 = vsel %vm1113_vm4, 1.0, %v3404_v2  ;;  %vm989_vm4 = vcmask 261120  }
 0x141   : > { %1007 = vperm.xlu1 %2989, %v995_v3   ;;  %1001 = vperm.xlu0 %2988, %v993_v4   ;;  %v994_v8 = vld [vmem:[%s4297_s25 + $0x8] sm:$0xff]  ;;  %v997_v12 = vld [vmem:[%s4297_s25 + $0x20] sm:$0xff]  ;;  %1117 = vst.msk [vmem:[#allocation4] sm:$0xff] %vm1116_vm3, %v2522_v13  ;;  %v999_v15 = vld [vmem:[%s4297_s25 + $0x30] sm:$0xff] }
 0x142   : > { %v998_v11 = vld [vmem:[%s4297_s25 + $0x28] sm:$0xff]  ;;  %v1050_v14 = vld [vmem:[%s4299_s22] sm:$0xff]  ;;  %v1052_v16 = vld [vmem:[%s4299_s22 + $0x10] sm:$0xff] }
 0x143   : > { %v1051_v17 = vld [vmem:[%s4299_s22 + $0x8] sm:$0xff]  ;;  %v1054_v18 = vld [vmem:[%s4299_s22 + $0x20] sm:$0xff]  ;;  %v1053_v19 = vld [vmem:[%s4299_s22 + $0x18] sm:$0xff] }
 0x144   : > { %v1056_v20 = vld [vmem:[%s4299_s22 + $0x30] sm:$0xff]  ;;  %v1055_v21 = vld [vmem:[%s4299_s22 + $0x28] sm:$0xff] }
 0x145   : > { %1010 = vperm.xlu1 %2989, %v996_v7   ;;  %1004 = vperm.xlu0 %2988, %v994_v8  }
 0x149   : > { %1016 = vperm.xlu1 %2989, %v998_v11   ;;  %1013 = vperm.xlu0 %2988, %v997_v12  }
 0x14d   : > { %1058 = vperm.xlu1 %2989, %v1050_v14   ;;  %1019 = vperm.xlu0 %2988, %v999_v15  }
 0x151   : > { %1064 = vperm.xlu1 %2989, %v1052_v16   ;;  %1061 = vperm.xlu0 %2988, %v1051_v17  }
 0x155   : > { %1070 = vperm.xlu1 %2989, %v1054_v18   ;;  %1067 = vperm.xlu0 %2988, %v1053_v19  }
 0x159   : > { %1076 = vperm.xlu1 %2989, %v1056_v20   ;;  %1073 = vperm.xlu0 %2988, %v1055_v21  }
 0x1c0   : > { %v1008_v23 = vpop.permute.xlu1 %1007  ;;  %v1002_v24 = vpop.permute.xlu0 %1001 }
 0x1c1   : > { %vm1023_vm6 = vcmp.eq.s32.totalorder %v992_v22, %v1008_v23  ;;  %vm1021_vm7 = vcmp.eq.s32.totalorder %v992_v22, %v1002_v24 }
 0x1c2   : > { %v2509_v25 = vsel %vm1023_vm6, 1.0, %v3404_v2  ;;  %v2507_v26 = vsel %vm1021_vm7, 1.0, %v3404_v2 }
 0x1c3   : > { %1045 = vst.msk [vmem:[#allocation3 + $0x10] sm:$0xff] %vm1042_vm5, %v2509_v25  ;;  %1043 = vst.msk [vmem:[#allocation3] sm:$0xff] %vm1042_vm5, %v2507_v26 }
 0x1c4   : > { %v1011_v27 = vpop.permute.xlu1 %1010  ;;  %v1005_v28 = vpop.permute.xlu0 %1004 }
 0x1c5   : > { %vm1024_vm8 = vcmp.eq.s32.totalorder %v992_v22, %v1011_v27  ;;  %vm1022_vm9 = vcmp.eq.s32.totalorder %v992_v22, %v1005_v28 }
 0x1c6   : > { %v2510_v29 = vsel %vm1024_vm8, 1.0, %v3404_v2  ;;  %v2508_v30 = vsel %vm1022_vm9, 1.0, %v3404_v2 }
 0x1c7   : > { %1046 = vst.msk [vmem:[#allocation3 + $0x18] sm:$0xff] %vm1042_vm5, %v2510_v29  ;;  %1044 = vst.msk [vmem:[#allocation3 + $0x8] sm:$0xff] %vm1042_vm5, %v2508_v30 }
 0x1c8   : > { %v1017_v31 = vpop.permute.xlu1 %1016  ;;  %v1014_v32 = vpop.permute.xlu0 %1013 }
 0x1c9   : > { %vm1026_vm10 = vcmp.eq.s32.totalorder %v992_v22, %v1017_v31  ;;  %vm1025_vm11 = vcmp.eq.s32.totalorder %v992_v22, %v1014_v32 }
 0x1ca   : > { %v2512_v33 = vsel %vm1026_vm10, 1.0, %v3404_v2  ;;  %v2511_v34 = vsel %vm1025_vm11, 1.0, %v3404_v2 }
 0x1cb   : > { %1048 = vst.msk [vmem:[#allocation3 + $0x28] sm:$0xff] %vm1042_vm5, %v2512_v33  ;;  %1047 = vst.msk [vmem:[#allocation3 + $0x20] sm:$0xff] %vm1042_vm5, %v2511_v34 }
 0x1cc   : > { %v1059_v35 = vpop.permute.xlu1 %1058  ;;  %v1020_v36 = vpop.permute.xlu0 %1019 }
 0x1cd   : > { %vm1078_vm12 = vcmp.eq.s32.totalorder %v992_v22, %v1059_v35  ;;  %vm1027_vm13 = vcmp.eq.s32.totalorder %v992_v22, %v1020_v36 }
 0x1ce   : > { %v2514_v37 = vsel %vm1078_vm12, 1.0, %v3404_v2  ;;  %v2513_v38 = vsel %vm1027_vm13, 1.0, %v3404_v2 }
 0x1cf   : > { %1099 = vst.msk [vmem:[#allocation5] sm:$0xff] %vm1042_vm5, %v2514_v37  ;;  %1049 = vst.msk [vmem:[#allocation3 + $0x30] sm:$0xff] %vm1042_vm5, %v2513_v38 }
 0x1d0   : > { %v1065_v39 = vpop.permute.xlu1 %1064  ;;  %v1062_v40 = vpop.permute.xlu0 %1061 }
 0x1d1   : > { %vm1080_vm14 = vcmp.eq.s32.totalorder %v992_v22, %v1065_v39  ;;  %vm1079_vm15 = vcmp.eq.s32.totalorder %v992_v22, %v1062_v40 }
 0x1d2   : > { %v2516_v41 = vsel %vm1080_vm14, 1.0, %v3404_v2  ;;  %v2515_v42 = vsel %vm1079_vm15, 1.0, %v3404_v2 }
 0x1d3   : > { %1101 = vst.msk [vmem:[#allocation5 + $0x10] sm:$0xff] %vm1042_vm5, %v2516_v41  ;;  %1100 = vst.msk [vmem:[#allocation5 + $0x8] sm:$0xff] %vm1042_vm5, %v2515_v42 }
 0x1d4   : > { %v1071_v43 = vpop.permute.xlu1 %1070  ;;  %v1068_v44 = vpop.permute.xlu0 %1067 }
 0x1d5   : > { %vm1082_vm0 = vcmp.eq.s32.totalorder %v992_v22, %v1071_v43  ;;  %vm1081_vm1 = vcmp.eq.s32.totalorder %v992_v22, %v1068_v44 }
 0x1d6   : > { %v2518_v45 = vsel %vm1082_vm0, 1.0, %v3404_v2  ;;  %v2517_v46 = vsel %vm1081_vm1, 1.0, %v3404_v2 }
 0x1d7   : > { %1103 = vst.msk [vmem:[#allocation5 + $0x20] sm:$0xff] %vm1042_vm5, %v2518_v45  ;;  %1102 = vst.msk [vmem:[#allocation5 + $0x18] sm:$0xff] %vm1042_vm5, %v2517_v46 }
 0x1d8   : > { %v1077_v47 = vpop.permute.xlu1 %1076  ;;  %v1074_v48 = vpop.permute.xlu0 %1073 }
 0x1d9   : > { %vm1084_vm2 = vcmp.eq.s32.totalorder %v992_v22, %v1077_v47  ;;  %vm1083_vm3 = vcmp.eq.s32.totalorder %v992_v22, %v1074_v48 }
 0x1da   : > { %v2520_v49 = vsel %vm1084_vm2, 1.0, %v3404_v2  ;;  %v2519_v50 = vsel %vm1083_vm3, 1.0, %v3404_v2 }
 0x1db   : > { %1105 = vst.msk [vmem:[#allocation5 + $0x30] sm:$0xff] %vm1042_vm5, %v2520_v49  ;;  %1104 = vst.msk [vmem:[#allocation5 + $0x28] sm:$0xff] %vm1042_vm5, %v2519_v50 }
 0x211   : > { %v985_v52 = vpop.f32.mrb[0].mxu0 }
 0x212   : > { %v986_v53 = vadd.f32 %v2504_v51, %v985_v52  ;;  %v2660_v54 = vpop.f32.mrb[1].mxu0 }
 0x214   : > { %990 = vst.msk [vmem:[#allocation2] sm:$0xff] %vm989_vm4, %v986_v53 }
 0x215 PF: > { %v1119_v55 = vld [vmem:[%s3911_s23] sm:$0xff]  ;;  %v1120_v56 = vld [vmem:[%s3911_s23 + $0x8] sm:$0xff]  ;;  %v1121_v57 = vld [vmem:[%s3911_s23 + $0x10] sm:$0xff]  ;;  %v3407_v58 = vmov 0.0|0.0   ;;  %vm3408_vm5 = vmmov 0   ;;  %v3409_v61 = vmov 0.0  }
 0x216   : > { %2831 = vmatprep.subr.bf16.mxu0 %v3407_v58  ;;  %v2832_v59 = vpack.c.bf16 %v1120_v56, %v1119_v55  ;;  %v1122_v60 = vld [vmem:[%s3911_s23 + $0x18] sm:$0xff]  ;;  %2669 = vmatprep.mubr.msk.f32.mxu0 %vm3408_vm5, %v3409_v61  ;;  %vm1123_vm6 = vcmask 261120   ;;  %vm1215_vm7 = vcmask 64512   ;;  %v1197_v0 = vld [vmem:[#allocation3] sm:$0xff]  ;;  %s3410_s23 = smov 96   ;;  %v1198_v3 = vld [vmem:[#allocation3 + $0x8] sm:$0xff] }
 0x217   : > { %2672 = vmatprep.subr.mxu1 %v3409_v61  ;;  %2674 = vmatprep.mubr.msk.f32.mxu1 %vm3408_vm5, %v3409_v61  ;;  %v2835_v62 = vpack.c.bf16 %v1122_v60, %v1121_v57  ;;  %v1199_v4 = vld [vmem:[#allocation3 + $0x10] sm:$0xff]  ;;  %v1200_v5 = vld [vmem:[#allocation3 + $0x18] sm:$0xff]  ;;  %v1201_v6 = vld [vmem:[#allocation3 + $0x20] sm:$0xff]  ;;  %vm1488_vm8 = vcmask 1041408   ;;  %s4300_s0 = sld [smem:[#allocation27_spill]]  ;;  %vm1466_vm9 = vcmask 15360  }
 0x218   : > { %2833 = vmatpush3.bf16.msra.mxu0 %v2832_v59  ;;  %v1202_v7 = vld [vmem:[#allocation3 + $0x28] sm:$0xff]  ;;  %v1203_v8 = vld [vmem:[#allocation3 + $0x30] sm:$0xff]  ;;  %v1204_v9 = vld [vmem:[#allocation5] sm:$0xff]  ;;  %vm1844_vm10 = vcmask 457728   ;;  %p2576_p2 = scmp.ne.s32.totalorder %s3533_s1, 3 }
 0x219   : > { %2834 = vmatprep.subr.bf16.mxu0 %v3407_v58  ;;  %v1465_v11 = vld [vmem:[%s3916_s2] sm:$0x3]  ;;  %v1205_v12 = vld [vmem:[#allocation5 + $0x8] sm:$0xff]  ;;  %v1206_v13 = vld [vmem:[#allocation5 + $0x10] sm:$0xff]  ;;  %vm3412_vm11 = vmmov (!%p2576_p2), 0   ;;  %vm2259_vm12 = vcmask (!%p2576_p2), 31744  }
 0x21a   : > { %v1207_v14 = vld [vmem:[#allocation5 + $0x18] sm:$0xff]  ;;  %v1208_v15 = vld [vmem:[#allocation5 + $0x20] sm:$0xff]  ;;  %v1209_v16 = vld [vmem:[#allocation5 + $0x28] sm:$0xff]  ;;  %s4305_s10 = sld [smem:[#allocation38_spill]] (!%p2576_p2) }
 0x21b   : > { %v4015_v63 = vld [vmem:[#allocation2] sm:$0xff]  ;;  %v1210_v17 = vld [vmem:[#allocation5 + $0x30] sm:$0xff]  ;;  %v1663_v40 = vld [vmem:[%s3921_s21 + $0x8] sm:$0xff] }
 0x21c   : > { %2836 = vmatpush3.bf16.msra.mxu0 %v2835_v62  ;;  %v1662_v39 = vld [vmem:[%s3921_s21] sm:$0xff]  ;;  %v1664_v42 = vld [vmem:[%s3921_s21 + $0x10] sm:$0xff]  ;;  %v1665_v43 = vld [vmem:[%s3921_s21 + $0x18] sm:$0xff] }
 0x21d   : > { %2695 = vmatprep.subr.mxu0 %v3409_v61  ;;  %s4301_s8 = smov %s4300_s0  ;;  %v1458_v18 = vld [vmem:[%s4300_s0] sm:$0xff]  ;;  %v2838_v41 = vpack.c.bf16 %v1663_v40, %v1662_v39  ;;  %v2841_v44 = vpack.c.bf16 %v1665_v43, %v1664_v42 }
 0x21e   : > { %v1459_v19 = vld [vmem:[%s4301_s8 + $0x8] sm:$0xff]  ;;  %v1460_v20 = vld [vmem:[%s4301_s8 + $0x10] sm:$0xff]  ;;  %v1461_v21 = vld [vmem:[%s4301_s8 + $0x18] sm:$0xff] }
 0x21f   : > { %2670 = vmatmul.mubr.msk.f32.vlgmr.msra.gmra.mrb[0].mxu0 %vm1123_vm6, %v4015_v63  ;;  %v1462_v22 = vld [vmem:[%s4301_s8 + $0x20] sm:$0xff]  ;;  %v1463_v23 = vld [vmem:[%s4301_s8 + $0x28] sm:$0xff]  ;;  %v1464_v24 = vld [vmem:[%s4301_s8 + $0x30] sm:$0xff] }
 0x220   : > { %2697 = vmatprep.mubr.msk.f32.mxu0 %vm3408_vm5, %v3409_v61 }
 0x2f2   : > { %v1193_v1 = vpop.f32.mrb[0].mxu0 }
 0x2f3   : > { %v2671_v2 = vpop.f32.mrb[1].mxu0  ;;  %1212 = vrot.lane.b32.xlu0 %v1193_v1, %s3410_s23  ;;  %2696 = vmatpush3.msra.mxu0 %v1193_v1 }
 0x2f4   : > { %2698 = vmatmul.mubr.msk.f32.vlgmr.msra.gmra.mrb[2].mxu0 %vm1215_vm7, %v1197_v0  ;;  %2837 = vmatprep.subr.bf16.mxu0 %v3407_v58 }
 0x2f5   : > { %2700 = vmatprep.mubr.msk.f32.mxu0 %vm3408_vm5, %v3409_v61  ;;  %2839 = vmatpush3.bf16.msra.mxu0 %v2838_v41 }
 0x2f6   : > { %2840 = vmatprep.subr.bf16.mxu0 %v3407_v58 }
 0x2f8   : > { %2701 = vmatmul.mubr.msk.f32.gmra.mrb[4].mxu0 %vm1215_vm7, %v1198_v3 }
 0x2f9   : > { %2703 = vmatprep.mubr.msk.f32.mxu0 %vm3408_vm5, %v3409_v61  ;;  %2842 = vmatpush3.bf16.msra.mxu0 %v2841_v44 }
 0x2fa   : > { %2858 = vmatprep.subr.bf16.mxu0 %v3407_v58 }
 0x2fc   : > { %2704 = vmatmul.mubr.msk.f32.gmra.mrb[6].mxu0 %vm1215_vm7, %v1199_v4 }
 0x2fd   : > { %2706 = vmatprep.mubr.msk.f32.mxu0 %vm3408_vm5, %v3409_v61 }
 0x300   : > { %2707 = vmatmul.mubr.msk.f32.gmra.mrb[8].mxu0 %vm1215_vm7, %v1200_v5 }
 0x301   : > { %2709 = vmatprep.mubr.msk.f32.mxu0 %vm3408_vm5, %v3409_v61 }
 0x304   : > { %2710 = vmatmul.mubr.msk.f32.gmra.mrb[10].mxu0 %vm1215_vm7, %v1201_v6  ;;  %v2546_v6 = vld [vmem:[%s739_s3] ss:$0 sm:$0xff]  ;;  %s4302_s3 = scalar_lea.vmem [#allocation14], %s3885_s17 }
 0x305   : > { %2712 = vmatprep.mubr.msk.f32.mxu0 %vm3408_vm5, %v3409_v61 }
 0x308   : > { %2713 = vmatmul.mubr.msk.f32.gmra.mrb[12].mxu0 %vm1215_vm7, %v1202_v7 }
 0x309   : > { %2715 = vmatprep.mubr.msk.f32.mxu0 %vm3408_vm5, %v3409_v61 }
 0x30c   : > { %2716 = vmatmul.mubr.msk.f32.gmra.mrb[14].mxu0 %vm1215_vm7, %v1203_v8 }
 0x30d   : > { %2749 = vmatprep.mubr.msk.f32.mxu0 %vm3408_vm5, %v3409_v61 }
 0x365   : > { %v1213_v10 = vpop.permute.xlu0 %1212 }
 0x366   : > { %2673 = vmatpush3.msra.mxu1 %v1213_v10 }
 0x367   : > { %2675 = vmatmul.mubr.msk.f32.vlgmr.msra.gmra.mrb[0].mxu1 %vm1215_vm7, %v1204_v9  ;;  %2718 = vmatprep.subr.mxu1 %v3409_v61 }
 0x368   : > { %2677 = vmatprep.mubr.msk.f32.mxu1 %vm3408_vm5, %v3409_v61  ;;  %2719 = vmatpush3.msk.msra.mxu1 %vm1488_vm8, %v1465_v11 }
 0x369   : > { %2843 = vmatprep.subr.bf16.mxu1 %v3407_v58 }
 0x36b   : > { %2678 = vmatmul.mubr.msk.f32.gmra.mrb[2].mxu1 %vm1215_vm7, %v1205_v12 }
 0x36c   : > { %2680 = vmatprep.mubr.msk.f32.mxu1 %vm3408_vm5, %v3409_v61 }
 0x36f   : > { %2681 = vmatmul.mubr.msk.f32.gmra.mrb[4].mxu1 %vm1215_vm7, %v1206_v13 }
 0x370   : > { %2683 = vmatprep.mubr.msk.f32.mxu1 %vm3408_vm5, %v3409_v61 }
 0x373   : > { %2684 = vmatmul.mubr.msk.f32.gmra.mrb[6].mxu1 %vm1215_vm7, %v1207_v14 }
 0x374   : > { %2686 = vmatprep.mubr.msk.f32.mxu1 %vm3408_vm5, %v3409_v61 }
 0x377   : > { %2687 = vmatmul.mubr.msk.f32.gmra.mrb[8].mxu1 %vm1215_vm7, %v1208_v15 }
 0x378   : > { %2689 = vmatprep.mubr.msk.f32.mxu1 %vm3408_vm5, %v3409_v61 }
 0x37b   : > { %2690 = vmatmul.mubr.msk.f32.gmra.mrb[10].mxu1 %vm1215_vm7, %v1209_v16 }
 0x37c   : > { %2692 = vmatprep.mubr.msk.f32.mxu1 %vm3408_vm5, %v3409_v61 }
 0x37f   : > { %2693 = vmatmul.mubr.msk.f32.gmra.mrb[12].mxu1 %vm1215_vm7, %v1210_v17 }
 0x380   : > { %2720 = vmatprep.mubr.msk.f32.mxu1 %vm3408_vm5, %v3409_v61 }
 0x383   : > { %2721 = vmatmul.mubr.msk.f32.vlgmr.msra.gmra.mrb[14].mxu1 %vm1466_vm9, %v1458_v18 }
 0x384   : > { %2723 = vmatprep.mubr.msk.f32.mxu1 %vm3408_vm5, %v3409_v61 }
 0x387   : > { %2724 = vmatmul.mubr.msk.f32.gmra.mrb[16].mxu1 %vm1466_vm9, %v1459_v19 }
 0x388   : > { %2726 = vmatprep.mubr.msk.f32.mxu1 %vm3408_vm5, %v3409_v61 }
 0x38b   : > { %2727 = vmatmul.mubr.msk.f32.gmra.mrb[18].mxu1 %vm1466_vm9, %v1460_v20 }
 0x38c   : > { %2729 = vmatprep.mubr.msk.f32.mxu1 %vm3408_vm5, %v3409_v61 }
 0x38f   : > { %2730 = vmatmul.mubr.msk.f32.gmra.mrb[20].mxu1 %vm1466_vm9, %v1461_v21 }
 0x390   : > { %2732 = vmatprep.mubr.msk.f32.mxu1 %vm3408_vm5, %v3409_v61 }
 0x393   : > { %2733 = vmatmul.mubr.msk.f32.gmra.mrb[22].mxu1 %vm1466_vm9, %v1462_v22 }
 0x394   : > { %2735 = vmatprep.mubr.msk.f32.mxu1 %vm3408_vm5, %v3409_v61 }
 0x397   : > { %2736 = vmatmul.mubr.msk.f32.gmra.mrb[24].mxu1 %vm1466_vm9, %v1463_v23 }
 0x398   : > { %2738 = vmatprep.mubr.msk.f32.mxu1 %vm3408_vm5, %v3409_v61 }
 0x39b   : > { %2739 = vmatmul.mubr.msk.f32.gmra.mrb[26].mxu1 %vm1466_vm9, %v1464_v24 }
 0x39c   : > { %2784 = vmatprep.mubr.msk.f32.mxu1 %vm3408_vm5, %v3409_v61 }
 0x3c7   : > { %v1424_v25 = vpop.f32.mrb[2].mxu0 }
 0x3c8   : > { %v2699_v26 = vpop.f32.mrb[3].mxu0 }
 0x3cb   : > { %v1429_v27 = vpop.f32.mrb[4].mxu0 }
 0x3cc   : > { %v2702_v28 = vpop.f32.mrb[5].mxu0 }
 0x3cf   : > { %v1434_v29 = vpop.f32.mrb[6].mxu0 }
 0x3d0   : > { %v2705_v30 = vpop.f32.mrb[7].mxu0 }
 0x3d3   : > { %v1439_v31 = vpop.f32.mrb[8].mxu0 }
 0x3d4   : > { %v2708_v32 = vpop.f32.mrb[9].mxu0 }
 0x3d7   : > { %v1444_v33 = vpop.f32.mrb[10].mxu0 }
 0x3d8   : > { %v2711_v34 = vpop.f32.mrb[11].mxu0 }
 0x3db   : > { %v1449_v35 = vpop.f32.mrb[12].mxu0 }
 0x3dc   : > { %v2714_v36 = vpop.f32.mrb[13].mxu0 }
 0x3df   : > { %v1454_v37 = vpop.f32.mrb[14].mxu0 }
 0x3e0   : > { %v2717_v38 = vpop.f32.mrb[15].mxu0 }
 0x43a   : > { %v1303_v45 = vpop.f32.mrb[0].mxu1 }
 0x43b   : > { %v1425_v46 = vadd.f32 %v1424_v25, %v1303_v45  ;;  %v2676_v47 = vpop.f32.mrb[1].mxu1 }
 0x43e   : > { %v1308_v48 = vpop.f32.mrb[2].mxu1 }
 0x43f   : > { %v1430_v49 = vadd.f32 %v1429_v27, %v1308_v48  ;;  %v2679_v50 = vpop.f32.mrb[3].mxu1 }
 0x442   : > { %v1313_v51 = vpop.f32.mrb[4].mxu1 }
 0x443   : > { %v1435_v52 = vadd.f32 %v1434_v29, %v1313_v51  ;;  %v2682_v53 = vpop.f32.mrb[5].mxu1 }
 0x446   : > { %v1318_v54 = vpop.f32.mrb[6].mxu1 }
 0x447   : > { %v1440_v55 = vadd.f32 %v1439_v31, %v1318_v54  ;;  %v2685_v56 = vpop.f32.mrb[7].mxu1 }
 0x44a   : > { %v1323_v57 = vpop.f32.mrb[8].mxu1 }
 0x44b   : > { %v1445_v59 = vadd.f32 %v1444_v33, %v1323_v57  ;;  %v2688_v60 = vpop.f32.mrb[9].mxu1 }
 0x44e   : > { %v1328_v62 = vpop.f32.mrb[10].mxu1 }
 0x44f   : > { %v1450_v0 = vadd.f32 %v1449_v35, %v1328_v62  ;;  %v2691_v1 = vpop.f32.mrb[11].mxu1 }
 0x452   : > { %v1333_v2 = vpop.f32.mrb[12].mxu1 }
 0x453   : > { %v1455_v3 = vadd.f32 %v1454_v37, %v1333_v2  ;;  %v2694_v4 = vpop.f32.mrb[13].mxu1 }
 0x456   : > { %v1558_v5 = vpop.f32.mrb[14].mxu1 }
 0x457   : > { %v1592_v7 = vadd.f32 %v1558_v5, %v1425_v46  ;;  %v2722_v8 = vpop.f32.mrb[15].mxu1 }
 0x458   : > { %v1918_v8 = vld [vmem:[%s3894_s5] sm:$0xff] }
 0x459   : > { %v1606_v9 = vadd.f32 %v2546_v6, %v1592_v7 }
 0x45a   : > { %v1563_v10 = vpop.f32.mrb[16].mxu1 }
 0x45b   : > { %v2547_v11 = vmul.f32 -1.442695, %v1606_v9  ;;  %v1593_v12 = vadd.f32 %v1563_v10, %v1430_v49  ;;  %v2725_v13 = vpop.f32.mrb[17].mxu1 }
 0x45d   : > { %2990 = vpow2.f32 %v2547_v11  ;;  %v1607_v14 = vadd.f32 %v2546_v6, %v1593_v12  ;;  %v1920_v11 = vld [vmem:[%s3894_s5 + $0x10] sm:$0xff]  ;;  %v1921_v12 = vld [vmem:[%s3894_s5 + $0x18] sm:$0xff] }
 0x45e   : > { %v1568_v15 = vpop.f32.mrb[18].mxu1  ;;  %v2862_v13 = vpack.c.bf16 %v1921_v12, %v1920_v11  ;;  %v1922_v12 = vld [vmem:[%s3896_s11] sm:$0xff] }
 0x45f   : > { %v2548_v16 = vmul.f32 -1.442695, %v1607_v14  ;;  %v1594_v17 = vadd.f32 %v1568_v15, %v1435_v52  ;;  %v2728_v18 = vpop.f32.mrb[19].mxu1 }
 0x461   : > { %2992 = vpow2.f32 %v2548_v16  ;;  %v1608_v19 = vadd.f32 %v2546_v6, %v1594_v17 }
 0x462   : > { %v1573_v20 = vpop.f32.mrb[20].mxu1 }
 0x463   : > { %v2549_v21 = vmul.f32 -1.442695, %v1608_v19  ;;  %v1595_v22 = vadd.f32 %v1573_v20, %v1440_v55  ;;  %v2731_v23 = vpop.f32.mrb[21].mxu1 }
 0x465   : > { %2994 = vpow2.f32 %v2549_v21  ;;  %v1609_v24 = vadd.f32 %v2546_v6, %v1595_v22 }
 0x466   : > { %v1578_v25 = vpop.f32.mrb[22].mxu1 }
 0x467   : > { %v2991_v26 = vpop.eup %2990  ;;  %v2550_v27 = vmul.f32 -1.442695, %v1609_v24  ;;  %v1596_v28 = vadd.f32 %v1578_v25, %v1445_v59  ;;  %v2734_v29 = vpop.f32.mrb[23].mxu1 }
 0x468   : > { %v1634_v30 = vadd.f32 1.0, %v2991_v26 }
 0x469   : > { %2996 = vpow2.f32 %v2550_v27  ;;  %v1610_v31 = vadd.f32 %v2546_v6, %v1596_v28 }
 0x46a   : > { %2998 = vrcp.f32 %v1634_v30  ;;  %v1583_v32 = vpop.f32.mrb[24].mxu1 }
 0x46b   : > { %v2993_v33 = vpop.eup %2992  ;;  %v2551_v34 = vmul.f32 -1.442695, %v1610_v31  ;;  %v1597_v35 = vadd.f32 %v1583_v32, %v1450_v0  ;;  %v2737_v36 = vpop.f32.mrb[25].mxu1 }
 0x46c   : > { %v1635_v37 = vadd.f32 1.0, %v2993_v33 }
 0x46d   : > { %3000 = vpow2.f32 %v2551_v34  ;;  %v1611_v38 = vadd.f32 %v2546_v6, %v1597_v35 }
 0x46e   : > { %3002 = vrcp.f32 %v1635_v37  ;;  %v1588_v39 = vpop.f32.mrb[26].mxu1 }
 0x46f   : > { %v2995_v40 = vpop.eup %2994  ;;  %v2552_v41 = vmul.f32 -1.442695, %v1611_v38  ;;  %v1598_v42 = vadd.f32 %v1588_v39, %v1455_v3  ;;  %v2740_v43 = vpop.f32.mrb[27].mxu1 }
 0x470   : > { %v1636_v44 = vadd.f32 1.0, %v2995_v40 }
 0x471   : > { %3004 = vpow2.f32 %v2552_v41  ;;  %v1612_v45 = vadd.f32 %v2546_v6, %v1598_v42 }
 0x472   : > { %3006 = vrcp.f32 %v1636_v44 }
 0x473   : > { %v2997_v46 = vpop.eup %2996  ;;  %v2553_v47 = vmul.f32 -1.442695, %v1612_v45 }
 0x474   : > { %v2999_v48 = vpop.eup %2998  ;;  %v1637_v49 = vadd.f32 1.0, %v2997_v46 }
 0x475   : > { %v1655_v50 = vmul.f32 %v2999_v48, %v1606_v9  ;;  %3008 = vpow2.f32 %v2553_v47  ;;  %v1919_v9 = vld [vmem:[%s3894_s5 + $0x8] sm:$0xff] }
 0x476   : > { %3010 = vrcp.f32 %v1637_v49  ;;  %v2859_v10 = vpack.c.bf16 %v1919_v9, %v1918_v8 }
 0x477   : > { %v3001_v51 = vpop.eup %3000  ;;  %2750 = vmatmul.mubr.msk.f32.vlgmr.msra.gmra.mrb[16].mxu0 %vm1123_vm6, %v1655_v50 }
 0x478   : > { %v3003_v52 = vpop.eup %3002  ;;  %v1638_v53 = vadd.f32 1.0, %v3001_v51  ;;  %2752 = vmatprep.mubr.msk.f32.mxu0 %vm3408_vm5, %v3409_v61  ;;  %2860 = vmatpush3.bf16.msra.mxu0 %v2859_v10 }
 0x479   : > { %v1656_v54 = vmul.f32 %v3003_v52, %v1607_v14  ;;  %2861 = vmatprep.subr.bf16.mxu0 %v3407_v58  ;;  %v2554_v14 = vld [vmem:[%s747_s7] ss:$0 sm:$0xff]  ;;  %s4303_s7 = scalar_lea.vmem [#allocation16], %s3885_s17 }
 0x47a   : > { %3012 = vrcp.f32 %v1638_v53 }
 0x47b   : > { %v3005_v55 = vpop.eup %3004  ;;  %2753 = vmatmul.mubr.msk.f32.gmra.mrb[18].mxu0 %vm1123_vm6, %v1656_v54 }
 0x47c   : > { %v3007_v56 = vpop.eup %3006  ;;  %v1639_v57 = vadd.f32 1.0, %v3005_v55  ;;  %2755 = vmatprep.mubr.msk.f32.mxu0 %vm3408_vm5, %v3409_v61  ;;  %2863 = vmatpush3.bf16.msra.mxu0 %v2862_v13  ;;  %v1923_v13 = vld [vmem:[%s3896_s11 + $0x8] sm:$0xff] }
 0x47d   : > { %v1657_v59 = vmul.f32 %v3007_v56, %v1608_v19 }
 0x47e   : > { %3014 = vrcp.f32 %v1639_v57 }
 0x47f   : > { %v3009_v60 = vpop.eup %3008  ;;  %2756 = vmatmul.mubr.msk.f32.gmra.mrb[20].mxu0 %vm1123_vm6, %v1657_v59 }
 0x480   : > { %v3011_v62 = vpop.eup %3010  ;;  %v1640_v0 = vadd.f32 1.0, %v3009_v60  ;;  %2758 = vmatprep.mubr.msk.f32.mxu0 %vm3408_vm5, %v3409_v61 }
 0x481   : > { %v1658_v1 = vmul.f32 %v3011_v62, %v1609_v24 }
 0x482   : > { %3016 = vrcp.f32 %v1640_v0 }
 0x483   : > { %2759 = vmatmul.mubr.msk.f32.gmra.mrb[22].mxu0 %vm1123_vm6, %v1658_v1 }
 0x484   : > { %v3013_v2 = vpop.eup %3012  ;;  %2761 = vmatprep.mubr.msk.f32.mxu0 %vm3408_vm5, %v3409_v61 }
 0x485   : > { %v1659_v3 = vmul.f32 %v3013_v2, %v1610_v31 }
 0x487   : > { %2762 = vmatmul.mubr.msk.f32.gmra.mrb[24].mxu0 %vm1123_vm6, %v1659_v3 }
 0x488   : > { %v3015_v4 = vpop.eup %3014  ;;  %2764 = vmatprep.mubr.msk.f32.mxu0 %vm3408_vm5, %v3409_v61 }
 0x489   : > { %v1660_v5 = vmul.f32 %v3015_v4, %v1611_v38 }
 0x48b   : > { %2765 = vmatmul.mubr.msk.f32.gmra.mrb[26].mxu0 %vm1123_vm6, %v1660_v5 }
 0x48c   : > { %v3017_v6 = vpop.eup %3016  ;;  %2767 = vmatprep.mubr.msk.f32.mxu0 %vm3408_vm5, %v3409_v61 }
 0x48d   : > { %v1661_v7 = vmul.f32 %v3017_v6, %v1612_v45 }
 0x48f   : > { %2768 = vmatmul.mubr.msk.f32.gmra.mrb[28].mxu0 %vm1123_vm6, %v1661_v7 }
 0x490   : > { %2806 = vmatprep.mubr.msk.f32.mxu0 %vm3408_vm5, %v3409_v61 }
 0x493   : > { %2807 = vmatmul.mubr.msk.f32.vlgmr.msra.gmra.mrb[30].mxu0 %vm1123_vm6, %v4015_v63 }
 0x54a   : > { %v1760_v15 = vpop.f32.mrb[16].mxu0 }
 0x54b   : > { %v1761_v16 = vadd.f32 %v2554_v14, %v1760_v15  ;;  %v2751_v17 = vpop.f32.mrb[17].mxu0  ;;  %v1843_v15 = vld [vmem:[#allocation4] sm:$0xff] }
 0x54c   : > { %v1924_v17 = vld [vmem:[%s3896_s11 + $0x10] sm:$0xff] }
 0x54d   : > { %v2562_v18 = vmul.f32 -1.442695, %v1761_v16 }
 0x54e   : > { %v1765_v19 = vpop.f32.mrb[18].mxu0 }
 0x54f   : > { %3018 = vpow2.f32 %v2562_v18  ;;  %v1766_v20 = vadd.f32 %v2554_v14, %v1765_v19  ;;  %v2754_v21 = vpop.f32.mrb[19].mxu0  ;;  %v1925_v18 = vld [vmem:[%s3896_s11 + $0x18] sm:$0xff] }
 0x550   : > { %v2856_v19 = vpack.c.bf16 %v1925_v18, %v1924_v17 }
 0x551   : > { %v2563_v22 = vmul.f32 -1.442695, %v1766_v20 }
 0x552   : > { %v1770_v23 = vpop.f32.mrb[20].mxu0 }
 0x553   : > { %3020 = vpow2.f32 %v2563_v22  ;;  %v1771_v24 = vadd.f32 %v2554_v14, %v1770_v23  ;;  %v2757_v25 = vpop.f32.mrb[21].mxu0 }
 0x554   : > { %v2085_v25 = vld [vmem:[%s3899_s29 + $0x8] sm:$0xff] }
 0x555   : > { %v2564_v26 = vmul.f32 -1.442695, %v1771_v24 }
 0x556   : > { %v1775_v27 = vpop.f32.mrb[22].mxu0 }
 0x557   : > { %3022 = vpow2.f32 %v2564_v26  ;;  %v1776_v28 = vadd.f32 %v2554_v14, %v1775_v27  ;;  %v2760_v29 = vpop.f32.mrb[23].mxu0  ;;  %v2086_v27 = vld [vmem:[%s3899_s29 + $0x10] sm:$0xff] }
 0x559   : > { %v3019_v30 = vpop.eup %3018  ;;  %v2565_v31 = vmul.f32 -1.442695, %v1776_v28 }
 0x55a   : > { %v1815_v32 = vadd.f32 1.0, %v3019_v30  ;;  %v1780_v33 = vpop.f32.mrb[24].mxu0 }
 0x55b   : > { %3024 = vpow2.f32 %v2565_v31  ;;  %v1781_v34 = vadd.f32 %v2554_v14, %v1780_v33  ;;  %v2763_v35 = vpop.f32.mrb[25].mxu0  ;;  %v2572_v31 = vld [vmem:[%s4302_s3] ss:$0 sm:$0xff] }
 0x55c   : > { %3026 = vrcp.f32 %v1815_v32 }
 0x55d   : > { %v3021_v36 = vpop.eup %3020  ;;  %v2566_v37 = vmul.f32 -1.442695, %v1781_v34 }
 0x55e   : > { %v1816_v38 = vadd.f32 1.0, %v3021_v36  ;;  %v1785_v39 = vpop.f32.mrb[26].mxu0 }
 0x55f   : > { %3028 = vpow2.f32 %v2566_v37  ;;  %v1786_v40 = vadd.f32 %v2554_v14, %v1785_v39  ;;  %v2766_v41 = vpop.f32.mrb[27].mxu0  ;;  %v2575_v39 = vld [vmem:[%s4303_s7] ss:$0 sm:$0xff] }
 0x560   : > { %3030 = vrcp.f32 %v1816_v38 }
 0x561   : > { %v3023_v42 = vpop.eup %3022  ;;  %v2567_v43 = vmul.f32 -1.442695, %v1786_v40 }
 0x562   : > { %v1817_v44 = vadd.f32 1.0, %v3023_v42  ;;  %v1790_v45 = vpop.f32.mrb[28].mxu0 }
 0x563   : > { %3032 = vpow2.f32 %v2567_v43  ;;  %v1791_v46 = vadd.f32 %v2554_v14, %v1790_v45  ;;  %v2769_v47 = vpop.f32.mrb[29].mxu0 }
 0x564   : > { %3034 = vrcp.f32 %v1817_v44 }
 0x565   : > { %v3025_v48 = vpop.eup %3024  ;;  %v2568_v49 = vmul.f32 -1.442695, %v1791_v46 }
 0x566   : > { %v1818_v50 = vadd.f32 1.0, %v3025_v48  ;;  %v3027_v51 = vpop.eup %3026  ;;  %v2065_v22 = vpop.f32.mrb[30].mxu0  ;;  %v3413_v48 = vmov (!%p2576_p2), 0.0  }
 0x567   : > { %3036 = vpow2.f32 %v2568_v49  ;;  %v1836_v55 = vmul.f32 %v3027_v51, %v1761_v16  ;;  %v2853_v16 = vpack.c.bf16 %v1923_v13, %v1922_v12  ;;  %v2808_v23 = vpop.f32.mrb[31].mxu0  ;;  %2828 = vmatprep.mubr.msk.f32.mxu0 (!%p2576_p2), %vm3412_vm11, %v3413_v48 }
 0x568   : > { %3038 = vrcp.f32 %v1818_v50  ;;  %v2577_v50 = vld [vmem:[#allocation17] ss:$0 sm:$0xff] (!%p2576_p2) }
 0x569   : > { %v3029_v52 = vpop.eup %3028 }
 0x56a   : > { %v3031_v53 = vpop.eup %3030  ;;  %v1819_v54 = vadd.f32 1.0, %v3029_v52 }
 0x56b   : > { %v1837_v56 = vmul.f32 %v3031_v53, %v1766_v20 }
 0x56c   : > { %3040 = vrcp.f32 %v1819_v54 }
 0x56d   : > { %v3033_v57 = vpop.eup %3032  ;;  %v2844_v59 = vpack.c.bf16 %v1837_v56, %v1836_v55 }
 0x56e   : > { %v1820_v60 = vadd.f32 1.0, %v3033_v57  ;;  %v3035_v62 = vpop.eup %3034 }
 0x56f   : > { %2845 = vmatpush3.bf16.msra.mxu1 %v2844_v59  ;;  %v1838_v3 = vmul.f32 %v3035_v62, %v1771_v24  ;;  %v2084_v24 = vld [vmem:[%s3899_s29] sm:$0xff] }
 0x570   : > { %3042 = vrcp.f32 %v1820_v60  ;;  %2846 = vmatprep.subr.bf16.mxu1 %v3407_v58  ;;  %v2865_v26 = vpack.c.bf16 %v2085_v25, %v2084_v24 }
 0x571   : > { %v3037_v0 = vpop.eup %3036 }
 0x572   : > { %v3039_v1 = vpop.eup %3038  ;;  %v1821_v2 = vadd.f32 1.0, %v3037_v0 }
 0x573   : > { %v1839_v4 = vmul.f32 %v3039_v1, %v1776_v28  ;;  %v2087_v28 = vld [vmem:[%s3899_s29 + $0x18] sm:$0xff]  ;;  %s4304_s29 = sld [smem:[#allocation37_spill]] (!%p2576_p2) }
 0x574   : > { %3044 = vrcp.f32 %v1821_v2  ;;  %v2868_v29 = vpack.c.bf16 %v2087_v28, %v2086_v27 }
 0x575   : > { %v2847_v5 = vpack.c.bf16 %v1839_v4, %v1838_v3 }
 0x576   : > { %v3041_v6 = vpop.eup %3040 }
 0x577   : > { %2848 = vmatpush3.bf16.msra.mxu1 %v2847_v5  ;;  %v1840_v8 = vmul.f32 %v3041_v6, %v1781_v34 }
 0x578   : > { %2849 = vmatprep.subr.bf16.mxu1 %v3407_v58 }
 0x579   : > { %v2175_v43 = vld [vmem:[%s4304_s29] sm:$0xff] (!%p2576_p2)  ;;  %v2176_v44 = vld [vmem:[%s4304_s29 + $0x8] sm:$0xff] (!%p2576_p2)  ;;  %v2177_v45 = vld [vmem:[%s4304_s29 + $0x10] sm:$0xff] (!%p2576_p2) }
 0x57a   : > { %v3043_v7 = vpop.eup %3042  ;;  %v2178_v47 = vld [vmem:[%s4304_s29 + $0x18] sm:$0xff] (!%p2576_p2) }
 0x57b   : > { %v1841_v9 = vmul.f32 %v3043_v7, %v1786_v40  ;;  %v2874_v49 = vpack.c.bf16 (!%p2576_p2), %v2178_v47, %v2177_v45 }
 0x57d   : > { %v2850_v10 = vpack.c.bf16 %v1841_v9, %v1840_v8 }
 0x57e   : > { %v3045_v11 = vpop.eup %3044 }
 0x57f   : > { %2851 = vmatpush3.bf16.msra.mxu1 %v2850_v10  ;;  %v1842_v14 = vmul.f32 %v3045_v11, %v1791_v46  ;;  %v2871_v46 = vpack.c.bf16 (!%p2576_p2), %v2176_v44, %v2175_v43 }
 0x580   : > { %2782 = vmatprep.subr.mxu1 %v3409_v61 }
 0x583   : > { %2783 = vmatpush3.msra.mxu1 %v1842_v14 }
 0x584   : > { %2785 = vmatmul.mubr.msk.f32.vlgmr.msra.gmra.mrb[28].mxu1 %vm1844_vm10, %v1843_v15  ;;  %2852 = vmatprep.subr.bf16.mxu1 %v3407_v58 }
 0x585   : > { %2854 = vmatpush3.bf16.msra.mxu1 %v2853_v16  ;;  %2795 = vmatprep.mubr.msk.f32.mxu1 %vm3408_vm5, %v3409_v61 }
 0x586   : > { %2855 = vmatprep.subr.bf16.mxu1 %v3407_v58 }
 0x589   : > { %2857 = vmatpush3.bf16.msra.mxu1 %v2856_v19 }
 0x58a   : > { %2864 = vmatprep.subr.bf16.mxu1 %v3407_v58 }
 0x657   : > { %v1914_v20 = vpop.f32.mrb[28].mxu1 }
 0x658   : > { %2796 = vmatmul.mubr.msk.f32.vlgmr.msra.gmra.mrb[30].mxu1 %vm1123_vm6, %v1914_v20  ;;  %v2786_v21 = vpop.f32.mrb[29].mxu1 }
 0x659   : > { %2817 = vmatprep.mubr.msk.f32.mxu1 %vm3408_vm5, %v3409_v61  ;;  %2866 = vmatpush3.bf16.msra.mxu1 %v2865_v26 }
 0x65a   : > { %2867 = vmatprep.subr.bf16.mxu1 %v3407_v58 }
 0x65d   : > { %2869 = vmatpush3.bf16.msra.mxu1 %v2868_v29 }
 0x72b   : > { %v1995_v30 = vpop.f32.mrb[30].mxu1 }
 0x72c   : > { %v2066_v32 = vadd.f32 %v2065_v22, %v1995_v30  ;;  %v2797_v33 = vpop.f32.mrb[31].mxu1 }
 0x72e   : > { %v2076_v34 = vadd.f32 %v2572_v31, %v2066_v32 }
 0x730   : > { %v2573_v61 = vmul.f32 -1.442695, %v2076_v34 }
 0x732   : > { %3046 = vpow2.f32 %v2573_v61 }
 0x73c   : > { %v3047_v35 = vpop.eup %3046 }
 0x73d   : > { %v2080_v36 = vadd.f32 1.0, %v3047_v35 }
 0x73f   : > { %3048 = vrcp.f32 %v2080_v36 }
 0x749   : > { %v3049_v37 = vpop.eup %3048 }
 0x74a   : > { %v2083_v38 = vmul.f32 %v3049_v37, %v2076_v34 }
 0x74c   : > { %2818 = vmatmul.mubr.msk.f32.vlgmr.msra.gmra.mrb[32].mxu1 %vm1123_vm6, %v2083_v38 }
 0x81e   : > { %2174 = sbr.rel (%p2576_p2) target bundleno = 2304 (0x900), region = 144 }
 0x81f   : > { %v2157_v58 = vpop.f32.mrb[32].mxu1 }
 0x820   : > { %v2161_v40 = vadd.f32 %v2157_v58, %v4015_v63  ;;  %v2819_v41 = vpop.f32.mrb[33].mxu1  ;;  %v3411_v63 = vmov (!%p2576_p2), 0.0|0.0  }
 0x821   : > { %2870 = vmatprep.subr.bf16.mxu0 (!%p2576_p2), %v3411_v63 }
 0x822   : > { %v2169_v42 = vadd.f32 %v2575_v39, %v2161_v40  ;;  %2872 = vmatpush3.bf16.msra.mxu0 (!%p2576_p2), %v2871_v46 }
 0x823   : > { %2873 = vmatprep.subr.bf16.mxu0 (!%p2576_p2), %v3411_v63 }
 0x824   : > { %2170 = vst.msk [vmem:[#allocation2] sm:$0xff] %vm1123_vm6, %v2169_v42 }
 0x826   : > { %2875 = vmatpush3.bf16.msra.mxu0 %v2874_v49 }
 0x829   : > { %2829 = vmatmul.mubr.msk.f32.vlgmr.msra.gmra.mrb[0].mxu0 %vm1123_vm6, %v2169_v42 }
 0x8fc   : > { %v2255_v51 = vpop.f32.mrb[0].mxu0 }
 0x8fd   : > { %v2256_v52 = vadd.f32 %v2577_v50, %v2255_v51  ;;  %v2830_v53 = vpop.f32.mrb[1].mxu0 }
 0x8ff   : > { %2260 = vst.msk [vmem:[%s4305_s10] sm:$0xff] %vm2259_vm12, %v2256_v52 }
 0x900 PF: > { %s4306_s21 = sld [smem:[#allocation23_spill]]  ;;  %s4307_s28 = sld [smem:[#allocation22_spill]] }
 0x901   : > { %s4308_s20 = sld [smem:[#allocation24_spill]]  ;;  %s4309_s0 = smov %s3382_s30 }
 0x906   : > { %p28_p11 = scmp.ge.s32.totalorder %s4306_s21, 6   ;;  %s4310_s30 = smov %s4307_s28 }
 0x908   :  { %30 = sbr.rel (!%p28_p11) target bundleno = 17 (0x11), region = 226 }
 0x90f   :  { %2272 = vsyncpa [#allocation7], 1 }
 0x910   :  { %2274 = vsyncpa [#allocation7 + $0x1], 1 }
 0x911   :  { %2275 = vsyncpa [#allocation9], 1 }

</bundles_post_ra>
